<compile_context>
chip_gen: v7x
topology: tpu7x:2x2x1
jax: 0.10.0
libtpu: 0.0.40
codegen_flags: <defaults>
</compile_context>

<pallas_src>
import functools

import jax
import jax.numpy as jnp
import numpy as np
from jax.experimental import pallas as pl
from jax.experimental.pallas import tpu as pltpu


def _round_up(x, m):
    return (x + m - 1) // m * m


# ----------------------------------------------------------------------------
# Single fused kernel: (folded) embedding + 5 MLP layers
# ----------------------------------------------------------------------------
def _generator_kernel(
    # VMEM inputs (auto-DMA'd, small)
    lbl_ref, noise_ref, pv_ref, w0f_ref, w0n_ref, w1_ref,
    # HBM inputs (manual DMA, int8)
    w2_hbm, w3_hbm, w4_hbm,
    # output
    out_ref,
    # scratch
    w2_v, w3_v, w4_v, dma_sems,
    *, nb_classes, eps, slope, seg,
):
    batch = noise_ref.shape[0]

    # Kick off the big-weight DMAs immediately; wait right before each use so
    # w3/w4 transfers hide behind earlier-layer compute.
    cp2 = pltpu.make_async_copy(w2_hbm, w2_v, dma_sems.at[0]); cp2.start()
    cp3 = pltpu.make_async_copy(w3_hbm, w3_v, dma_sems.at[1]); cp3.start()
    cp4 = pltpu.make_async_copy(w4_hbm, w4_v, dma_sems.at[2]); cp4.start()

    def leaky(x):
        return jnp.where(x >= 0, x, slope * x)

    def pslice(name):
        off, n = seg[name]                    # static, 128-aligned -> free view
        return pv_ref[:, off:off + n]

    # --- layer 0: (one_hot @ w0f) + (noise @ w0n) + b0, LeakyReLU (no BN) ---
    # w0f already contains  emb @ W0[:NC]  (folded at init), so the embedding
    # lookup is a single exact one-hot matmul against a fused bf16 table.
    lbl = lbl_ref[...]                                            # (B, 1) i32
    classes = jax.lax.broadcasted_iota(jnp.int32, (batch, nb_classes), 1)
    one_hot = (lbl == classes).astype(jnp.bfloat16)               # (B, NC)
    h = (jnp.dot(one_hot, w0f_ref[...], preferred_element_type=jnp.float32)
         + jnp.dot(noise_ref[...].astype(jnp.bfloat16), w0n_ref[...],
                   preferred_element_type=jnp.float32)
         + pslice("b0"))
    h = leaky(h)

    # BatchNorm1d (training-mode batch stats, biased variance) + LeakyReLU.
    # Linear bias omitted upstream: it cancels exactly in (y - mean).
    def bn(y, g, bt):
        mean = jnp.mean(y, axis=0, keepdims=True)
        var = jnp.mean(jnp.square(y - mean), axis=0, keepdims=True)
        y = (y - mean) * jax.lax.rsqrt(var + eps)
        return leaky(y * g + bt)

    # --- layer 1: Linear(128 -> 256) bf16 weight (already in VMEM) ----------
    y = jnp.dot(h.astype(jnp.bfloat16), w1_ref[...],
                preferred_element_type=jnp.float32)
    h = bn(y, pslice("g1"), pslice("bt1"))

    # --- layer 2: Linear(256 -> 512), int8 weight, post-dot column scale ----
    cp2.wait()
    y = jnp.dot(h.astype(jnp.bfloat16), w2_v[...].astype(jnp.bfloat16),
                preferred_element_type=jnp.float32) * pslice("s2")
    h = bn(y, pslice("g2"), pslice("bt2"))

    # --- layer 3: Linear(512 -> 1024), int8 weight --------------------------
    cp3.wait()
    y = jnp.dot(h.astype(jnp.bfloat16), w3_v[...].astype(jnp.bfloat16),
                preferred_element_type=jnp.float32) * pslice("s3")
    h = bn(y, pslice("g3"), pslice("bt3"))

    # --- layer 4: Linear(1024 -> img_flat, lane-padded), int8 + bias + Tanh -
    cp4.wait()
    y = (jnp.dot(h.astype(jnp.bfloat16), w4_v[...].astype(jnp.bfloat16),
                 preferred_element_type=jnp.float32) * pslice("s4")
         + pslice("b4"))
    out_ref[...] = jnp.tanh(y)


# ----------------------------------------------------------------------------
# Parameter construction (deterministic, mirrors PyTorch __init__ shapes)
# ----------------------------------------------------------------------------
def _quantize_cols(w):
    """Symmetric per-output-column int8 quantization."""
    amax = jnp.max(jnp.abs(w), axis=0)
    scale = jnp.where(amax > 0, amax / 127.0, 1.0)
    q = jnp.clip(jnp.round(w / scale), -127, 127).astype(jnp.int8)
    return q, scale.reshape(1, -1).astype(jnp.float32)


def init_generator_params(key, img_shape, latent_dim, nb_classes):
    img_flat = int(np.prod(img_shape))
    out_pad = _round_up(img_flat, 128)           # lane-dense final store
    dims = [(latent_dim + nb_classes, 128),
            (128, 256),
            (256, 512),
            (512, 1024),
            (1024, img_flat)]

    p = {"img_flat": img_flat}
    key, ek = jax.random.split(key)
    # nn.Embedding default init: N(0, 1)
    emb = jax.random.normal(ek, (nb_classes, nb_classes), jnp.float32)

    ws, bs = [], []
    for fin, fout in dims:
        key, wk, bk = jax.random.split(key, 3)
        bound = 1.0 / np.sqrt(fin)
        # stored as (in, out) so the kernel computes x @ W
        ws.append(jax.random.uniform(wk, (fin, fout), jnp.float32, -bound, bound))
        bs.append(jax.random.uniform(bk, (fout,), jnp.float32, -bound, bound))

    # layer 0: fold the embedding table into the top rows of W0 at init time.
    p["w0f"] = jnp.dot(emb, ws[0][:nb_classes],
                       precision=jax.lax.Precision.HIGHEST).astype(jnp.bfloat16)
    p["w0n"] = ws[0][nb_classes:].astype(jnp.bfloat16)

    # layer 1: small, shipped bf16 as a plain VMEM input.
    p["w1"] = ws[1].astype(jnp.bfloat16)

    # layers 2..3: int8 + per-column scale (Linear bias dropped: cancels in BN).
    p["w2q"], s2 = _quantize_cols(ws[2])
    p["w3q"], s3 = _quantize_cols(ws[3])

    # layer 4: zero-pad output features to a lane-dense multiple of 128, int8.
    w4 = jnp.zeros((1024, out_pad), jnp.float32).at[:, :img_flat].set(ws[4])
    b4 = jnp.zeros((1, out_pad), jnp.float32).at[:, :img_flat].set(bs[4])
    p["w4q"], s4 = _quantize_cols(w4)

    # Pack all tiny f32 params into one lane-aligned (1, P) vector.
    ones = lambda n: jnp.ones((1, n), jnp.float32)
    zeros = lambda n: jnp.zeros((1, n), jnp.float32)
    segments = [
        ("b0", bs[0].reshape(1, -1)),
        ("g1", ones(256)), ("bt1", zeros(256)),
        ("g2", ones(512)), ("bt2", zeros(512)), ("s2", s2),
        ("g3", ones(1024)), ("bt3", zeros(1024)), ("s3", s3),
        ("b4", b4), ("s4", s4),
    ]
    seg, pieces, off = {}, [], 0
    for name, arr in segments:
        n = arr.shape[1]
        assert n % 128 == 0, (name, n)          # keep every slice 128-aligned
        seg[name] = (off, n)
        pieces.append(arr)
        off += n
    p["pvec"] = jnp.concatenate(pieces, axis=1)
    p["seg"] = seg
    return p


# ----------------------------------------------------------------------------
# Forward pass of Generator (single pallas_call)
# ----------------------------------------------------------------------------
def generator_forward(params, noise, labels, img_shape):
    B = noise.shape[0]
    nb_classes = params["w0f"].shape[0]
    img_flat = params["img_flat"]
    out_pad = params["w4q"].shape[1]

    vmem = pl.BlockSpec(memory_space=pltpu.MemorySpace.VMEM)
    hbm = pl.BlockSpec(memory_space=pl.ANY)

    kernel = functools.partial(
        _generator_kernel, nb_classes=nb_classes, eps=0.8, slope=0.2,
        seg=params["seg"])

    labels_2d = labels.reshape(B, 1).astype(jnp.int32)

    out = pl.pallas_call(
        kernel,
        out_shape=jax.ShapeDtypeStruct((B, out_pad), jnp.float32),
        in_specs=[vmem] * 6 + [hbm] * 3,
        out_specs=vmem,
        scratch_shapes=[
            pltpu.VMEM(params["w2q"].shape, jnp.int8),
            pltpu.VMEM(params["w3q"].shape, jnp.int8),
            pltpu.VMEM(params["w4q"].shape, jnp.int8),
            pltpu.SemaphoreType.DMA((3,)),
        ],
    )(labels_2d, noise, params["pvec"],
      params["w0f"], params["w0n"], params["w1"],
      params["w2q"], params["w3q"], params["w4q"])

    # Slice off lane padding and reshape to NCHW, matching img.view(B, *IMG_SHAPE)
    return out[:, :img_flat].reshape((B,) + tuple(img_shape))


if __name__ == "__main__":
    IMG_SHAPE = (1, 8, 8)     # (C, H, W)
    LATENT_DIM = 32
    NB_CLASSES = 10
    BATCH = 4

    key = jax.random.PRNGKey(0)
    key, pkey, nkey, lkey = jax.random.split(key, 4)

    params = init_generator_params(pkey, IMG_SHAPE, LATENT_DIM, NB_CLASSES)
    noise = jax.random.normal(nkey, (BATCH, LATENT_DIM), jnp.float32)
    labels = jax.random.randint(lkey, (BATCH,), 0, NB_CLASSES, jnp.int32)

    img = generator_forward(params, noise, labels, IMG_SHAPE)
    img = jax.block_until_ready(img)

    assert img.shape == (BATCH,) + IMG_SHAPE, img.shape
    assert bool(jnp.all(jnp.isfinite(img)))
    assert bool(jnp.all(jnp.abs(img) <= 1.0))   # tanh output range
    print("KERNEL_OK")
</pallas_src>

<mosaic_0001>
module attributes {stable_mosaic.version = 11 : i64} {
  func.func @_generator_kernel(%arg0: memref<4x1xi32, #tpu.memory_space<vmem>>, %arg1: memref<4x32xf32, #tpu.memory_space<vmem>>, %arg2: memref<1x5504xf32, #tpu.memory_space<vmem>>, %arg3: memref<10x128xbf16, #tpu.memory_space<vmem>>, %arg4: memref<32x128xbf16, #tpu.memory_space<vmem>>, %arg5: memref<128x256xbf16, #tpu.memory_space<vmem>>, %arg6: memref<256x512xi8, #tpu.memory_space<any>>, %arg7: memref<512x1024xi8, #tpu.memory_space<any>>, %arg8: memref<1024x128xi8, #tpu.memory_space<any>>, %arg9: memref<4x128xf32, #tpu.memory_space<vmem>>, %arg10: memref<256x512xi8, #tpu.memory_space<vmem>>, %arg11: memref<512x1024xi8, #tpu.memory_space<vmem>>, %arg12: memref<1024x128xi8, #tpu.memory_space<vmem>>, %arg13: memref<3x!tpu.dma_semaphore, #tpu.memory_space<semaphore_mem>>) attributes {dimension_semantics = [], scalar_prefetch = 0 : i64, scratch_operands = 4 : i64, tpu.core_type = #tpu.core_type<tc>} {
    %c0_i32 = arith.constant 0 : i32
    %0 = tpu.memref_slice %arg13[%c0_i32] : memref<3x!tpu.dma_semaphore, #tpu.memory_space<semaphore_mem>> -> memref<1x!tpu.dma_semaphore, #tpu.memory_space<semaphore_mem>>
    %1 = tpu.memref_squeeze %0 : memref<1x!tpu.dma_semaphore, #tpu.memory_space<semaphore_mem>> -> memref<!tpu.dma_semaphore, #tpu.memory_space<semaphore_mem>>
    tpu.enqueue_dma source(%arg6 : memref<256x512xi8, #tpu.memory_space<any>>) target(%arg10 : memref<256x512xi8, #tpu.memory_space<vmem>>) target_semaphore(%1 : memref<!tpu.dma_semaphore, #tpu.memory_space<semaphore_mem>>)
    %c1_i32 = arith.constant 1 : i32
    %2 = tpu.memref_slice %arg13[%c1_i32] : memref<3x!tpu.dma_semaphore, #tpu.memory_space<semaphore_mem>> -> memref<1x!tpu.dma_semaphore, #tpu.memory_space<semaphore_mem>>
    %3 = tpu.memref_squeeze %2 : memref<1x!tpu.dma_semaphore, #tpu.memory_space<semaphore_mem>> -> memref<!tpu.dma_semaphore, #tpu.memory_space<semaphore_mem>>
    tpu.enqueue_dma source(%arg7 : memref<512x1024xi8, #tpu.memory_space<any>>) target(%arg11 : memref<512x1024xi8, #tpu.memory_space<vmem>>) target_semaphore(%3 : memref<!tpu.dma_semaphore, #tpu.memory_space<semaphore_mem>>)
    %c2_i32 = arith.constant 2 : i32
    %4 = tpu.memref_slice %arg13[%c2_i32] : memref<3x!tpu.dma_semaphore, #tpu.memory_space<semaphore_mem>> -> memref<1x!tpu.dma_semaphore, #tpu.memory_space<semaphore_mem>>
    %5 = tpu.memref_squeeze %4 : memref<1x!tpu.dma_semaphore, #tpu.memory_space<semaphore_mem>> -> memref<!tpu.dma_semaphore, #tpu.memory_space<semaphore_mem>>
    tpu.enqueue_dma source(%arg8 : memref<1024x128xi8, #tpu.memory_space<any>>) target(%arg12 : memref<1024x128xi8, #tpu.memory_space<vmem>>) target_semaphore(%5 : memref<!tpu.dma_semaphore, #tpu.memory_space<semaphore_mem>>)
    %c0 = arith.constant 0 : index
    %c0_0 = arith.constant 0 : index
    %6 = vector.load %arg0[%c0, %c0_0] : memref<4x1xi32, #tpu.memory_space<vmem>>, vector<4x1xi32>
    %7 = tpu.iota {dimensions = array<i32: 1>} : vector<4x10xi32>
    %8 = vector.broadcast %6 : vector<4x1xi32> to vector<4x10xi32>
    %9 = arith.cmpi eq, %8, %7 : vector<4x10xi32>
    %10 = arith.extui %9 : vector<4x10xi1> to vector<4x10xi32>
    %11 = arith.sitofp %10 : vector<4x10xi32> to vector<4x10xf32>
    %12 = arith.truncf %11 : vector<4x10xf32> to vector<4x10xbf16>
    %c0_1 = arith.constant 0 : index
    %c0_2 = arith.constant 0 : index
    %13 = vector.load %arg3[%c0_1, %c0_2] : memref<10x128xbf16, #tpu.memory_space<vmem>>, vector<10x128xbf16>
    %cst = arith.constant dense<0.000000e+00> : vector<4x128xf32>
    %14 = tpu.matmul %12, %13, %cst {dimension_numbers = #tpu.dot_dimension_numbers<[1], [0], [0], [1], [0, 0, 1, 1], [], []>} : vector<4x10xbf16>, vector<10x128xbf16>, vector<4x128xf32> -> vector<4x128xf32>
    %c0_3 = arith.constant 0 : index
    %c0_4 = arith.constant 0 : index
    %15 = vector.load %arg1[%c0_3, %c0_4] : memref<4x32xf32, #tpu.memory_space<vmem>>, vector<4x32xf32>
    %16 = arith.truncf %15 : vector<4x32xf32> to vector<4x32xbf16>
    %c0_5 = arith.constant 0 : index
    %c0_6 = arith.constant 0 : index
    %17 = vector.load %arg4[%c0_5, %c0_6] : memref<32x128xbf16, #tpu.memory_space<vmem>>, vector<32x128xbf16>
    %cst_7 = arith.constant dense<0.000000e+00> : vector<4x128xf32>
    %18 = tpu.matmul %16, %17, %cst_7 {dimension_numbers = #tpu.dot_dimension_numbers<[1], [0], [0], [1], [0, 0, 1, 1], [], []>} : vector<4x32xbf16>, vector<32x128xbf16>, vector<4x128xf32> -> vector<4x128xf32>
    %19 = arith.addf %14, %18 : vector<4x128xf32>
    %c0_8 = arith.constant 0 : index
    %c0_9 = arith.constant 0 : index
    %20 = vector.load %arg2[%c0_8, %c0_9] : memref<1x5504xf32, #tpu.memory_space<vmem>>, vector<1x128xf32>
    %21 = vector.broadcast %20 : vector<1x128xf32> to vector<4x128xf32>
    %22 = arith.addf %19, %21 : vector<4x128xf32>
    %cst_10 = arith.constant 0.000000e+00 : f32
    %23 = vector.broadcast %cst_10 : f32 to vector<4x128xf32>
    %24 = arith.cmpf oge, %22, %23 : vector<4x128xf32>
    %cst_11 = arith.constant 2.000000e-01 : f32
    %25 = vector.broadcast %cst_11 : f32 to vector<4x128xf32>
    %26 = arith.mulf %25, %22 : vector<4x128xf32>
    %27 = arith.select %24, %22, %26 : vector<4x128xi1>, vector<4x128xf32>
    %28 = arith.truncf %27 : vector<4x128xf32> to vector<4x128xbf16>
    %c0_12 = arith.constant 0 : index
    %c0_13 = arith.constant 0 : index
    %29 = vector.load %arg5[%c0_12, %c0_13] : memref<128x256xbf16, #tpu.memory_space<vmem>>, vector<128x256xbf16>
    %cst_14 = arith.constant dense<0.000000e+00> : vector<4x256xf32>
    %30 = tpu.matmul %28, %29, %cst_14 {dimension_numbers = #tpu.dot_dimension_numbers<[1], [0], [0], [1], [0, 0, 1, 1], [], []>} : vector<4x128xbf16>, vector<128x256xbf16>, vector<4x256xf32> -> vector<4x256xf32>
    %c0_15 = arith.constant 0 : index
    %c128 = arith.constant 128 : index
    %31 = vector.load %arg2[%c0_15, %c128] : memref<1x5504xf32, #tpu.memory_space<vmem>>, vector<1x256xf32>
    %c0_16 = arith.constant 0 : index
    %c384 = arith.constant 384 : index
    %32 = vector.load %arg2[%c0_16, %c384] : memref<1x5504xf32, #tpu.memory_space<vmem>>, vector<1x256xf32>
    %cst_17 = arith.constant dense<0.000000e+00> : vector<256xf32>
    %33 = vector.multi_reduction <add>, %30, %cst_17 [0] : vector<4x256xf32> to vector<256xf32>
    %34 = vector.shape_cast %33 : vector<256xf32> to vector<1x256xf32>
    %cst_18 = arith.constant 4.000000e+00 : f32
    %35 = vector.broadcast %cst_18 : f32 to vector<1x256xf32>
    %36 = arith.divf %34, %35 : vector<1x256xf32>
    %37 = vector.broadcast %36 : vector<1x256xf32> to vector<4x256xf32>
    %38 = arith.subf %30, %37 : vector<4x256xf32>
    %39 = arith.mulf %38, %38 : vector<4x256xf32>
    %cst_19 = arith.constant dense<0.000000e+00> : vector<256xf32>
    %40 = vector.multi_reduction <add>, %39, %cst_19 [0] : vector<4x256xf32> to vector<256xf32>
    %41 = vector.shape_cast %40 : vector<256xf32> to vector<1x256xf32>
    %cst_20 = arith.constant 4.000000e+00 : f32
    %42 = vector.broadcast %cst_20 : f32 to vector<1x256xf32>
    %43 = arith.divf %41, %42 : vector<1x256xf32>
    %44 = vector.broadcast %36 : vector<1x256xf32> to vector<4x256xf32>
    %45 = arith.subf %30, %44 : vector<4x256xf32>
    %cst_21 = arith.constant 8.000000e-01 : f32
    %46 = vector.broadcast %cst_21 : f32 to vector<1x256xf32>
    %47 = arith.addf %43, %46 : vector<1x256xf32>
    %48 = math.rsqrt %47 : vector<1x256xf32>
    %49 = vector.broadcast %48 : vector<1x256xf32> to vector<4x256xf32>
    %50 = arith.mulf %45, %49 : vector<4x256xf32>
    %51 = vector.broadcast %31 : vector<1x256xf32> to vector<4x256xf32>
    %52 = arith.mulf %50, %51 : vector<4x256xf32>
    %53 = vector.broadcast %32 : vector<1x256xf32> to vector<4x256xf32>
    %54 = arith.addf %52, %53 : vector<4x256xf32>
    %cst_22 = arith.constant 0.000000e+00 : f32
    %55 = vector.broadcast %cst_22 : f32 to vector<4x256xf32>
    %56 = arith.cmpf oge, %54, %55 : vector<4x256xf32>
    %cst_23 = arith.constant 2.000000e-01 : f32
    %57 = vector.broadcast %cst_23 : f32 to vector<4x256xf32>
    %58 = arith.mulf %57, %54 : vector<4x256xf32>
    %59 = arith.select %56, %54, %58 : vector<4x256xi1>, vector<4x256xf32>
    %c0_i32_24 = arith.constant 0 : i32
    %60 = tpu.memref_slice %arg13[%c0_i32_24] : memref<3x!tpu.dma_semaphore, #tpu.memory_space<semaphore_mem>> -> memref<1x!tpu.dma_semaphore, #tpu.memory_space<semaphore_mem>>
    %61 = tpu.memref_squeeze %60 : memref<1x!tpu.dma_semaphore, #tpu.memory_space<semaphore_mem>> -> memref<!tpu.dma_semaphore, #tpu.memory_space<semaphore_mem>>
    tpu.wait_dma2 semaphore(%61 : memref<!tpu.dma_semaphore, #tpu.memory_space<semaphore_mem>>) src(%arg6 : memref<256x512xi8, #tpu.memory_space<any>>) dst(%arg10 : memref<256x512xi8, #tpu.memory_space<vmem>>)
    %62 = arith.truncf %59 : vector<4x256xf32> to vector<4x256xbf16>
    %c0_25 = arith.constant 0 : index
    %c0_26 = arith.constant 0 : index
    %63 = vector.load %arg10[%c0_25, %c0_26] : memref<256x512xi8, #tpu.memory_space<vmem>>, vector<256x512xi8>
    %64 = arith.sitofp %63 : vector<256x512xi8> to vector<256x512xbf16>
    %cst_27 = arith.constant dense<0.000000e+00> : vector<4x512xf32>
    %65 = tpu.matmul %62, %64, %cst_27 {dimension_numbers = #tpu.dot_dimension_numbers<[1], [0], [0], [1], [0, 0, 1, 1], [], []>} : vector<4x256xbf16>, vector<256x512xbf16>, vector<4x512xf32> -> vector<4x512xf32>
    %c0_28 = arith.constant 0 : index
    %c1664 = arith.constant 1664 : index
    %66 = vector.load %arg2[%c0_28, %c1664] : memref<1x5504xf32, #tpu.memory_space<vmem>>, vector<1x512xf32>
    %67 = vector.broadcast %66 : vector<1x512xf32> to vector<4x512xf32>
    %68 = arith.mulf %65, %67 : vector<4x512xf32>
    %c0_29 = arith.constant 0 : index
    %c640 = arith.constant 640 : index
    %69 = vector.load %arg2[%c0_29, %c640] : memref<1x5504xf32, #tpu.memory_space<vmem>>, vector<1x512xf32>
    %c0_30 = arith.constant 0 : index
    %c1152 = arith.constant 1152 : index
    %70 = vector.load %arg2[%c0_30, %c1152] : memref<1x5504xf32, #tpu.memory_space<vmem>>, vector<1x512xf32>
    %cst_31 = arith.constant dense<0.000000e+00> : vector<512xf32>
    %71 = vector.multi_reduction <add>, %68, %cst_31 [0] : vector<4x512xf32> to vector<512xf32>
    %72 = vector.shape_cast %71 : vector<512xf32> to vector<1x512xf32>
    %cst_32 = arith.constant 4.000000e+00 : f32
    %73 = vector.broadcast %cst_32 : f32 to vector<1x512xf32>
    %74 = arith.divf %72, %73 : vector<1x512xf32>
    %75 = vector.broadcast %74 : vector<1x512xf32> to vector<4x512xf32>
    %76 = arith.subf %68, %75 : vector<4x512xf32>
    %77 = arith.mulf %76, %76 : vector<4x512xf32>
    %cst_33 = arith.constant dense<0.000000e+00> : vector<512xf32>
    %78 = vector.multi_reduction <add>, %77, %cst_33 [0] : vector<4x512xf32> to vector<512xf32>
    %79 = vector.shape_cast %78 : vector<512xf32> to vector<1x512xf32>
    %cst_34 = arith.constant 4.000000e+00 : f32
    %80 = vector.broadcast %cst_34 : f32 to vector<1x512xf32>
    %81 = arith.divf %79, %80 : vector<1x512xf32>
    %82 = vector.broadcast %74 : vector<1x512xf32> to vector<4x512xf32>
    %83 = arith.subf %68, %82 : vector<4x512xf32>
    %cst_35 = arith.constant 8.000000e-01 : f32
    %84 = vector.broadcast %cst_35 : f32 to vector<1x512xf32>
    %85 = arith.addf %81, %84 : vector<1x512xf32>
    %86 = math.rsqrt %85 : vector<1x512xf32>
    %87 = vector.broadcast %86 : vector<1x512xf32> to vector<4x512xf32>
    %88 = arith.mulf %83, %87 : vector<4x512xf32>
    %89 = vector.broadcast %69 : vector<1x512xf32> to vector<4x512xf32>
    %90 = arith.mulf %88, %89 : vector<4x512xf32>
    %91 = vector.broadcast %70 : vector<1x512xf32> to vector<4x512xf32>
    %92 = arith.addf %90, %91 : vector<4x512xf32>
    %cst_36 = arith.constant 0.000000e+00 : f32
    %93 = vector.broadcast %cst_36 : f32 to vector<4x512xf32>
    %94 = arith.cmpf oge, %92, %93 : vector<4x512xf32>
    %cst_37 = arith.constant 2.000000e-01 : f32
    %95 = vector.broadcast %cst_37 : f32 to vector<4x512xf32>
    %96 = arith.mulf %95, %92 : vector<4x512xf32>
    %97 = arith.select %94, %92, %96 : vector<4x512xi1>, vector<4x512xf32>
    %c1_i32_38 = arith.constant 1 : i32
    %98 = tpu.memref_slice %arg13[%c1_i32_38] : memref<3x!tpu.dma_semaphore, #tpu.memory_space<semaphore_mem>> -> memref<1x!tpu.dma_semaphore, #tpu.memory_space<semaphore_mem>>
    %99 = tpu.memref_squeeze %98 : memref<1x!tpu.dma_semaphore, #tpu.memory_space<semaphore_mem>> -> memref<!tpu.dma_semaphore, #tpu.memory_space<semaphore_mem>>
    tpu.wait_dma2 semaphore(%99 : memref<!tpu.dma_semaphore, #tpu.memory_space<semaphore_mem>>) src(%arg7 : memref<512x1024xi8, #tpu.memory_space<any>>) dst(%arg11 : memref<512x1024xi8, #tpu.memory_space<vmem>>)
    %100 = arith.truncf %97 : vector<4x512xf32> to vector<4x512xbf16>
    %c0_39 = arith.constant 0 : index
    %c0_40 = arith.constant 0 : index
    %101 = vector.load %arg11[%c0_39, %c0_40] : memref<512x1024xi8, #tpu.memory_space<vmem>>, vector<512x1024xi8>
    %102 = arith.sitofp %101 : vector<512x1024xi8> to vector<512x1024xbf16>
    %cst_41 = arith.constant dense<0.000000e+00> : vector<4x1024xf32>
    %103 = tpu.matmul %100, %102, %cst_41 {dimension_numbers = #tpu.dot_dimension_numbers<[1], [0], [0], [1], [0, 0, 1, 1], [], []>} : vector<4x512xbf16>, vector<512x1024xbf16>, vector<4x1024xf32> -> vector<4x1024xf32>
    %c0_42 = arith.constant 0 : index
    %c4224 = arith.constant 4224 : index
    %104 = vector.load %arg2[%c0_42, %c4224] : memref<1x5504xf32, #tpu.memory_space<vmem>>, vector<1x1024xf32>
    %105 = vector.broadcast %104 : vector<1x1024xf32> to vector<4x1024xf32>
    %106 = arith.mulf %103, %105 : vector<4x1024xf32>
    %c0_43 = arith.constant 0 : index
    %c2176 = arith.constant 2176 : index
    %107 = vector.load %arg2[%c0_43, %c2176] : memref<1x5504xf32, #tpu.memory_space<vmem>>, vector<1x1024xf32>
    %c0_44 = arith.constant 0 : index
    %c3200 = arith.constant 3200 : index
    %108 = vector.load %arg2[%c0_44, %c3200] : memref<1x5504xf32, #tpu.memory_space<vmem>>, vector<1x1024xf32>
    %cst_45 = arith.constant dense<0.000000e+00> : vector<1024xf32>
    %109 = vector.multi_reduction <add>, %106, %cst_45 [0] : vector<4x1024xf32> to vector<1024xf32>
    %110 = vector.shape_cast %109 : vector<1024xf32> to vector<1x1024xf32>
    %cst_46 = arith.constant 4.000000e+00 : f32
    %111 = vector.broadcast %cst_46 : f32 to vector<1x1024xf32>
    %112 = arith.divf %110, %111 : vector<1x1024xf32>
    %113 = vector.broadcast %112 : vector<1x1024xf32> to vector<4x1024xf32>
    %114 = arith.subf %106, %113 : vector<4x1024xf32>
    %115 = arith.mulf %114, %114 : vector<4x1024xf32>
    %cst_47 = arith.constant dense<0.000000e+00> : vector<1024xf32>
    %116 = vector.multi_reduction <add>, %115, %cst_47 [0] : vector<4x1024xf32> to vector<1024xf32>
    %117 = vector.shape_cast %116 : vector<1024xf32> to vector<1x1024xf32>
    %cst_48 = arith.constant 4.000000e+00 : f32
    %118 = vector.broadcast %cst_48 : f32 to vector<1x1024xf32>
    %119 = arith.divf %117, %118 : vector<1x1024xf32>
    %120 = vector.broadcast %112 : vector<1x1024xf32> to vector<4x1024xf32>
    %121 = arith.subf %106, %120 : vector<4x1024xf32>
    %cst_49 = arith.constant 8.000000e-01 : f32
    %122 = vector.broadcast %cst_49 : f32 to vector<1x1024xf32>
    %123 = arith.addf %119, %122 : vector<1x1024xf32>
    %124 = math.rsqrt %123 : vector<1x1024xf32>
    %125 = vector.broadcast %124 : vector<1x1024xf32> to vector<4x1024xf32>
    %126 = arith.mulf %121, %125 : vector<4x1024xf32>
    %127 = vector.broadcast %107 : vector<1x1024xf32> to vector<4x1024xf32>
    %128 = arith.mulf %126, %127 : vector<4x1024xf32>
    %129 = vector.broadcast %108 : vector<1x1024xf32> to vector<4x1024xf32>
    %130 = arith.addf %128, %129 : vector<4x1024xf32>
    %cst_50 = arith.constant 0.000000e+00 : f32
    %131 = vector.broadcast %cst_50 : f32 to vector<4x1024xf32>
    %132 = arith.cmpf oge, %130, %131 : vector<4x1024xf32>
    %cst_51 = arith.constant 2.000000e-01 : f32
    %133 = vector.broadcast %cst_51 : f32 to vector<4x1024xf32>
    %134 = arith.mulf %133, %130 : vector<4x1024xf32>
    %135 = arith.select %132, %130, %134 : vector<4x1024xi1>, vector<4x1024xf32>
    %c2_i32_52 = arith.constant 2 : i32
    %136 = tpu.memref_slice %arg13[%c2_i32_52] : memref<3x!tpu.dma_semaphore, #tpu.memory_space<semaphore_mem>> -> memref<1x!tpu.dma_semaphore, #tpu.memory_space<semaphore_mem>>
    %137 = tpu.memref_squeeze %136 : memref<1x!tpu.dma_semaphore, #tpu.memory_space<semaphore_mem>> -> memref<!tpu.dma_semaphore, #tpu.memory_space<semaphore_mem>>
    tpu.wait_dma2 semaphore(%137 : memref<!tpu.dma_semaphore, #tpu.memory_space<semaphore_mem>>) src(%arg8 : memref<1024x128xi8, #tpu.memory_space<any>>) dst(%arg12 : memref<1024x128xi8, #tpu.memory_space<vmem>>)
    %138 = arith.truncf %135 : vector<4x1024xf32> to vector<4x1024xbf16>
    %c0_53 = arith.constant 0 : index
    %c0_54 = arith.constant 0 : index
    %139 = vector.load %arg12[%c0_53, %c0_54] : memref<1024x128xi8, #tpu.memory_space<vmem>>, vector<1024x128xi8>
    %140 = arith.sitofp %139 : vector<1024x128xi8> to vector<1024x128xbf16>
    %cst_55 = arith.constant dense<0.000000e+00> : vector<4x128xf32>
    %141 = tpu.matmul %138, %140, %cst_55 {dimension_numbers = #tpu.dot_dimension_numbers<[1], [0], [0], [1], [0, 0, 1, 1], [], []>} : vector<4x1024xbf16>, vector<1024x128xbf16>, vector<4x128xf32> -> vector<4x128xf32>
    %c0_56 = arith.constant 0 : index
    %c5376 = arith.constant 5376 : index
    %142 = vector.load %arg2[%c0_56, %c5376] : memref<1x5504xf32, #tpu.memory_space<vmem>>, vector<1x128xf32>
    %143 = vector.broadcast %142 : vector<1x128xf32> to vector<4x128xf32>
    %144 = arith.mulf %141, %143 : vector<4x128xf32>
    %c0_57 = arith.constant 0 : index
    %c5248 = arith.constant 5248 : index
    %145 = vector.load %arg2[%c0_57, %c5248] : memref<1x5504xf32, #tpu.memory_space<vmem>>, vector<1x128xf32>
    %146 = vector.broadcast %145 : vector<1x128xf32> to vector<4x128xf32>
    %147 = arith.addf %144, %146 : vector<4x128xf32>
    %148 = math.tanh %147 : vector<4x128xf32>
    %c0_58 = arith.constant 0 : index
    %c0_59 = arith.constant 0 : index
    %149 = vector.load %arg9[%c0_58, %c0_59] : memref<4x128xf32, #tpu.memory_space<vmem>>, vector<4x128xf32>
    tpu.vector_store %arg9[%c0_58, %c0_59], %148 {strides = array<i32>} : memref<4x128xf32, #tpu.memory_space<vmem>>, vector<4x128xf32>,
    return
  }
}

</mosaic_0001>

<bundles_post_ra>
// kernel: tpu_custom_call.1
= control target key start
LH: loop header
LB: loop body
LE: loop exit
PB: predicated region body
PF: predicated region fallthrough
CT: control target
= control target key end

     0   :  { %14 = vsyncpa [#allocation7], 0  ;;  %s2957_s0 = inlined_call_operand.vmem [shape: s32[4,1], index: 0, kind: input, shape index: {}]   ;;  %s2958_s1 = inlined_call_operand.vmem [shape: f32[4,32], index: 1, kind: input, shape index: {}]   ;;  %s2959_s2 = inlined_call_operand.hbm [shape: f32[1,5504], index: 2, kind: input, shape index: {}]   ;;  %s2960_s3 = inlined_call_operand.hbm [shape: bf16[10,128], index: 3, kind: input, shape index: {}]   ;;  %s2961_s4 = inlined_call_operand.vmem [shape: bf16[32,128], index: 4, kind: input, shape index: {}]   ;;  %s2962_s5 = inlined_call_operand.hbm [shape: bf16[128,256], index: 5, kind: input, shape index: {}]   ;;  %s2963_s6 = inlined_call_operand.hbm [shape: s8[256,512], index: 6, kind: input, shape index: {}]   ;;  %s2964_s7 = inlined_call_operand.hbm [shape: s8[512,1024], index: 7, kind: input, shape index: {}]   ;;  %s2965_s8 = inlined_call_operand.hbm [shape: s8[1024,128], index: 8, kind: input, shape index: {}]   ;;  %s2966_s9 = inlined_call_operand.hbm [shape: f32[4,128], index: 9, kind: output, shape index: {}]  }
   0x1   :  { %15 = vsyncpa [#allocation10], 0 }
   0x2   :  { %16 = vsyncpa [#allocation8], 0  ;;  %s2587_s30 = smov [#allocation9]   ;;  %s2421_s13 = scalar_lea.hbm %s2960_s3, 128 }
   0x3   :  { %s36_s10 = sshll.u32 %s2587_s30, 4  ;;  %p2422_p0 = scmp.ne.s32.totalorder %s2960_s3, %s2421_s13  ;;  %s37_s10 = int_to_ptr.vmem [resolvable:$true] %s36_s10 }
   0x4   :  { %p2425_p1 = scmp.lt.u32.totalorder %s2421_s13, %s2960_s3 }
   0x6   :  { %p2427_p2 = pnand %p2425_p1, %p2422_p0 }
   0x8   :  { %2430 = shalt.err (!%p2427_p2)
}
   0x9   :  { %s2431_s18 = scalar_lea.vmem %s37_s10, 128  ;;  %p2436_p4 = scmp.lt.s32.totalorder %s37_s10, %s37_s10 }
   0xa   :  { %p2432_p3 = scmp.ne.s32.totalorder %s37_s10, %s2431_s18  ;;  %p2437_p5 = scmp.lt.s32.totalorder %s2431_s18, %s2431_s18 }
   0xc   :  { %p2438_p6 = por %p2437_p5, %p2436_p4 }
   0xe   :  { %p2439_p7 = pnand %p2438_p6, %p2432_p3 }
  0x10   :  { %2442 = shalt.err (!%p2439_p7)
}
  0x11   :  { %s2588_s19 = smov 64   ;;  %s2589_s20 = smov 4  }
  0x12   :  { %42 = dma.hbm_to_vmem [thread:$0]  %s2960_s3, 128, %s37_s10, [#allocation10], %s2588_s19, %s2588_s19, %s2589_s20  }
  0x13   :  { %s2590_s23 = smov [#allocation6]   ;;  %s2591_s25 = smov [#allocation11]  }
  0x14   :  { %s27_s24 = sshll.u32 %s2590_s23, 4  ;;  %s50_s26 = sshll.u32 %s2591_s25, 4  ;;  %s28_s24 = int_to_ptr.vmem [resolvable:$true] %s27_s24  ;;  %s51_s26 = int_to_ptr.vmem [resolvable:$true] %s50_s26 }
  0x15   :  { %s2443_s29 = scalar_lea.hbm %s2959_s2, 688 }
  0x16   :  { %p2444_p8 = scmp.ne.s32.totalorder %s2959_s2, %s2443_s29  ;;  %p2447_p9 = scmp.lt.u32.totalorder %s2443_s29, %s2959_s2 }
  0x18   :  { %p2449_p10 = pnand %p2447_p9, %p2444_p8 }
  0x1a   :  { %2452 = shalt.err (!%p2449_p10)
}
  0x1b   :  { %s2453_s3 = scalar_lea.vmem %s28_s24, 688  ;;  %s2457_s10 = scalar_lea.vmem %s28_s24, 704 }
  0x1c   :  { %p2454_p11 = scmp.ne.s32.totalorder %s28_s24, %s2453_s3  ;;  %p2458_p12 = scmp.lt.s32.totalorder %s28_s24, %s28_s24 }
  0x1d   :  { %p2459_p13 = scmp.lt.s32.totalorder %s2457_s10, %s2453_s3 }
  0x1f   :  { %p2460_p0 = por %p2459_p13, %p2458_p12 }
  0x21   :  { %p2461_p1 = pnand %p2460_p0, %p2454_p11 }
  0x23   :  { %2464 = shalt.err (!%p2461_p1)
}
  0x24   :  { %30 = dma.hbm_to_vmem [thread:$0]  %s2959_s2, 688, %s28_s24, [#allocation7]  }
  0x25   :  { %s2465_s18 = scalar_lea.hbm %s2962_s5, 2048 }
  0x26   :  { %p2466_p2 = scmp.ne.s32.totalorder %s2962_s5, %s2465_s18  ;;  %p2469_p3 = scmp.lt.u32.totalorder %s2465_s18, %s2962_s5 }
  0x28   :  { %p2471_p4 = pnand %p2469_p3, %p2466_p2 }
  0x2a   :  { %2474 = shalt.err (!%p2471_p4)
}
  0x2b   :  { %s2475_s23 = scalar_lea.vmem %s51_s26, 2048  ;;  %p2480_p6 = scmp.lt.s32.totalorder %s51_s26, %s51_s26 }
  0x2c   :  { %p2476_p5 = scmp.ne.s32.totalorder %s51_s26, %s2475_s23  ;;  %p2481_p7 = scmp.lt.s32.totalorder %s2475_s23, %s2475_s23 }
  0x2e   :  { %p2482_p8 = por %p2481_p7, %p2480_p6 }
  0x30   :  { %p2483_p9 = pnand %p2482_p8, %p2476_p5 }
  0x32   :  { %2486 = shalt.err (!%p2483_p9)
}
  0x33   :  { %s2592_s2 = smov 128   ;;  %s2593_s24 = smov 8  }
  0x34   :  { %56 = dma.hbm_to_vmem [thread:$0]  %s2962_s5, 2048, %s51_s26, [#allocation10], %s2592_s2, %s2592_s2, %s2593_s24  }
  0x35   :  { %2575 = dma.done.wait [#allocation7], 688  }
  0x36   :  { %2576 = vsyncadd [#allocation7], 4294966608 }
  0x37   :  { %2577 = dma.done.wait [#allocation10], 2176  }
  0x38   :  { %2578 = vsyncadd [#allocation10], 4294965120  ;;  %v2594_v0 = vmov 0   ;;  %v2595_v1 = vmov 0.0   ;;  %vm2596_vm0 = vmmov 0   ;;  %v2364_v3 = vld [vmem:[%s2961_s4] sm:$0xff]   ;;  %v103_v21 = vlaneseq }
  0x39   :  { %2363 = vset.pattern.permute.xlu0 %v2594_v0  ;;  %2319 = vmatprep.subr.bf16.mxu0 %v2595_v1  ;;  %v102_v2 = vld [vmem:[%s2957_s0] sm:$0xf]  ;;  %v2365_v4 = vld [vmem:[%s2961_s4 + $0x8] sm:$0xff]   ;;  %vm185_vm1 = vcmask 1044480   ;;  %v2369_v8 = vld [vmem:[#allocation11] ss:$8 sps:$4 sm:$0xff]  }
  0x3a   :  { %2323 = vmatprep.mubr.msk.bf16.mxu0 %vm2596_vm0, %v2595_v1  ;;  %369 = vmatprep.mubr.bf16.mxu1 %v2594_v0  ;;  %v114_v5 = vld [vmem:[%s2958_s1] sm:$0xf]  ;;  %v2366_v6 = vld [vmem:[#allocation9] sm:$0x1f]   ;;  %vm132_vm2 = vcmask 261120   ;;  %v104_v22 = vand.u32 127, %v103_v21 }
  0x3b   :  { %106 = vperm.xlu0 %2363, %v102_v2   ;;  %2320 = vmatpush3.bf16.msra.mxu0 %v2364_v3  ;;  %v2367_v7 = vld [vmem:[#allocation11 + $0x4] ss:$8 sps:$4 sm:$0xff]   ;;  %v115_v9 = vpack.c.bf16 %v114_v5, %v114_v5  ;;  %v2370_v10 = vld [vmem:[#allocation11 + $0x14] ss:$8 sps:$4 sm:$0xff]   ;;  %v2372_v11 = vld [vmem:[#allocation11 + $0x10] ss:$8 sps:$4 sm:$0xff]  }
  0x3c   :  { %2321 = vmatprep.subr.bf16.mxu0 %v2595_v1  ;;  %337 = vmatprep.subr.bf16.mxu1 %v2367_v7  ;;  %v2373_v12 = vld [vmem:[#allocation11 + $0x24] ss:$8 sps:$4 sm:$0xff]   ;;  %v187_v13 = vsel %vm185_vm1, %v2366_v6, 0  ;;  %v2375_v14 = vld [vmem:[#allocation11 + $0x20] ss:$8 sps:$4 sm:$0xff]   ;;  %vm181_vm4 = vcmask 80896  }
  0x3d   :  { %338 = vmatpush1.bf16.msra.mxu1 %v2369_v8  ;;  %v2376_v15 = vld [vmem:[#allocation11 + $0x34] ss:$8 sps:$4 sm:$0xff]   ;;  %v2378_v16 = vld [vmem:[#allocation11 + $0x30] ss:$8 sps:$4 sm:$0xff]   ;;  %v2379_v17 = vld [vmem:[#allocation11 + $0x44] ss:$8 sps:$4 sm:$0xff]  }
  0x3e   :  { %339 = vmatprep.subr.bf16.mxu1 %v2370_v10  ;;  %v2381_v18 = vld [vmem:[#allocation11 + $0x40] ss:$8 sps:$4 sm:$0xff]   ;;  %v2382_v19 = vld [vmem:[#allocation11 + $0x54] ss:$8 sps:$4 sm:$0xff]   ;;  %v2384_v20 = vld [vmem:[#allocation11 + $0x50] ss:$8 sps:$4 sm:$0xff]  }
  0x3f   :  { %2322 = vmatpush3.bf16.msra.mxu0 %v2365_v4  ;;  %v2385_v26 = vld [vmem:[#allocation11 + $0x64] ss:$8 sps:$4 sm:$0xff]   ;;  %v2387_v27 = vld [vmem:[#allocation11 + $0x60] ss:$8 sps:$4 sm:$0xff]   ;;  %v2388_v28 = vld [vmem:[#allocation11 + $0x74] ss:$8 sps:$4 sm:$0xff]  }
  0x40   :  { %2327 = vmatprep.subr.bf16.mxu0 %v2595_v1  ;;  %v2390_v30 = vld [vmem:[#allocation11 + $0x70] ss:$8 sps:$4 sm:$0xff]   ;;  %v2204_v35 = vld [vmem:[#allocation6] ss:$0 sm:$0xff]  ;;  %s2597_s0 = smov [#allocation2]   ;;  %s2598_s4 = smov [#allocation3]  }
  0x41   :  { %340 = vmatpush1.bf16.msra.mxu1 %v2372_v11  ;;  %s74_s1 = sshll.u32 %s2597_s0, 4  ;;  %s86_s3 = sshll.u32 %s2598_s4, 4  ;;  %s75_s1 = int_to_ptr.vmem [resolvable:$true] %s74_s1  ;;  %s87_s3 = int_to_ptr.vmem [resolvable:$true] %s86_s3 }
  0x42   :  { %2324 = vmatmul.mubr.msk.bf16.vlgmr.msra.gmra.mrb[0].mxu0 %vm132_vm2, %v115_v9  ;;  %341 = vmatprep.subr.bf16.mxu1 %v2373_v12  ;;  %s2487_s15 = scalar_lea.hbm %s2963_s6, 4096 }
  0x43   :  { %2328 = vmatpush3.bf16.msra.mxu0 %v187_v13  ;;  %2329 = vmatprep.mubr.msk.bf16.mxu0 %vm2596_vm0, %v2595_v1  ;;  %p2488_p10 = scmp.ne.s32.totalorder %s2963_s6, %s2487_s15  ;;  %p2491_p11 = scmp.lt.u32.totalorder %s2487_s15, %s2963_s6 }
  0x45   :  { %342 = vmatpush1.bf16.msra.mxu1 %v2375_v14  ;;  %p2493_p12 = pnand %p2491_p11, %p2488_p10 }
  0x46   :  { %343 = vmatprep.subr.bf16.mxu1 %v2376_v15 }
  0x49   :  { %344 = vmatpush1.bf16.msra.mxu1 %v2378_v16 }
  0x4a   :  { %345 = vmatprep.subr.bf16.mxu1 %v2379_v17 }
  0x4d   :  { %346 = vmatpush1.bf16.msra.mxu1 %v2381_v18 }
  0x4e   :  { %347 = vmatprep.subr.bf16.mxu1 %v2382_v19 }
  0x51   :  { %348 = vmatpush1.bf16.msra.mxu1 %v2384_v20 }
  0x52   :  { %349 = vmatprep.subr.bf16.mxu1 %v2385_v26 }
  0x55   :  { %350 = vmatpush1.bf16.msra.mxu1 %v2387_v27 }
  0x56   :  { %351 = vmatprep.subr.bf16.mxu1 %v2388_v28 }
  0x59   :  { %352 = vmatpush1.bf16.msra.mxu1 %v2390_v30 }
  0xba   :  { %v107_v23 = vpop.permute.xlu0 %106 }
  0xbb   :  { %vm108_vm3 = vcmp.eq.s32.totalorder %v107_v23, %v104_v22 }
  0xbc   :  { %v2198_v24 = vsel %vm108_vm3, 1.0, %v2595_v1 }
  0xbd   :  { %v111_v25 = vpack.c.bf16 %v2198_v24, %v2198_v24 }
  0xbf   :  { %2330 = vmatmul.mubr.msk.bf16.vlgmr.msra.gmra.mrb[4].mxu0 %vm181_vm4, %v111_v25 }
 0x115   :  { %v170_v29 = vpop.f32.mrb[0].mxu0 }
 0x116   :  { %v2325_v31 = vpop.f32.mrb[1].mxu0 }
 0x117   :  { %v173_v32 = vpop.f32.mrb[2].mxu0 }
 0x118   :  { %v2326_v33 = vpop.f32.mrb[3].mxu0 }
 0x192   :  { %v223_v34 = vpop.f32.mrb[4].mxu0 }
 0x193   :  { %v224_v36 = vadd.f32 %v223_v34, %v170_v29  ;;  %v2331_v37 = vpop.f32.mrb[5].mxu0 }
 0x194   :  { %v226_v38 = vpop.f32.mrb[6].mxu0 }
 0x195   :  { %v236_v39 = vadd.f32 %v2204_v35, %v224_v36  ;;  %v2332_v40 = vpop.f32.mrb[7].mxu0 }
 0x197   :  { %v238_v41 = vmul.f32 0.2, %v236_v39  ;;  %vm237_vm5 = vcmp.ge.f32.partialorder %v236_v39, 0.0 }
 0x199   :  { %v239_v42 = vsel %vm237_vm5, %v236_v39, %v238_v41 }
 0x19a   :  { %v240_v43 = vpack.c.bf16 %v239_v42, %v239_v42 }
 0x19c   :  { %370 = vmatmul.mubr.bf16.vlgmr.msra.gmra.mrb[0].mxu1 %v240_v43 }
 0x19d   :  { %2496 = shalt.err (!%p2493_p12)  }
 0x19e   :  { %s2497_s20 = scalar_lea.vmem %s75_s1, 4096  ;;  %p2502_p0 = scmp.lt.s32.totalorder %s75_s1, %s75_s1 }
 0x19f   :  { %p2498_p13 = scmp.ne.s32.totalorder %s75_s1, %s2497_s20  ;;  %p2503_p1 = scmp.lt.s32.totalorder %s2497_s20, %s2497_s20 }
 0x1a1   :  { %p2504_p2 = por %p2503_p1, %p2502_p0 }
 0x1a3   :  { %p2505_p3 = pnand %p2504_p2, %p2498_p13 }
 0x1a5   :  { %2508 = shalt.err (!%p2505_p3)  }
 0x1a6   :  { %77 = dma.hbm_to_vmem [thread:$0]  %s2963_s6, 4096, %s75_s1, [#allocation5] }
 0x1a7   :  { %s2509_s24 = scalar_lea.hbm %s2964_s7, 16384 }
 0x1a8   :  { %p2510_p4 = scmp.ne.s32.totalorder %s2964_s7, %s2509_s24  ;;  %p2513_p5 = scmp.lt.u32.totalorder %s2509_s24, %s2964_s7 }
 0x1aa   :  { %p2515_p6 = pnand %p2513_p5, %p2510_p4 }
 0x1ac   :  { %2518 = shalt.err (!%p2515_p6)  }
 0x1ad   :  { %s2519_s30 = scalar_lea.vmem %s87_s3, 16384  ;;  %p2524_p8 = scmp.lt.s32.totalorder %s87_s3, %s87_s3 }
 0x1ae   :  { %p2520_p7 = scmp.ne.s32.totalorder %s87_s3, %s2519_s30  ;;  %p2525_p9 = scmp.lt.s32.totalorder %s2519_s30, %s2519_s30 }
 0x1b0   :  { %p2526_p10 = por %p2525_p9, %p2524_p8 }
 0x1b2   :  { %p2527_p11 = pnand %p2526_p10, %p2520_p7 }
 0x1b4   :  { %2530 = shalt.err (!%p2527_p11)  }
 0x1b5   :  { %89 = dma.hbm_to_vmem [thread:$0]  %s2964_s7, 16384, %s87_s3, [#allocation5 + $0x1] }
 0x1b6   :  { %s2599_s5 = smov [#allocation4]   ;;  %s2531_s0 = scalar_lea.hbm %s2965_s8, 4096 }
 0x1b7   :  { %s98_s26 = sshll.u32 %s2599_s5, 4  ;;  %p2532_p12 = scmp.ne.s32.totalorder %s2965_s8, %s2531_s0  ;;  %s99_s26 = int_to_ptr.vmem [resolvable:$true] %s98_s26 }
 0x1b8   :  { %p2535_p13 = scmp.lt.u32.totalorder %s2531_s0, %s2965_s8 }
 0x1ba   :  { %p2537_p0 = pnand %p2535_p13, %p2532_p12 }
 0x1bc   :  { %2540 = shalt.err (!%p2537_p0)  }
 0x1bd   :  { %s2541_s15 = scalar_lea.vmem %s99_s26, 4096  ;;  %p2546_p2 = scmp.lt.s32.totalorder %s99_s26, %s99_s26 }
 0x1be   :  { %p2542_p1 = scmp.ne.s32.totalorder %s99_s26, %s2541_s15  ;;  %p2547_p3 = scmp.lt.s32.totalorder %s2541_s15, %s2541_s15 }
 0x1c0   :  { %p2548_p4 = por %p2547_p3, %p2546_p2 }
 0x1c2   :  { %p2549_p5 = pnand %p2548_p4, %p2542_p1 }
 0x1c4   :  { %2552 = shalt.err (!%p2549_p5)  }
 0x1c5   :  { %101 = dma.hbm_to_vmem [thread:$0]  %s2965_s8, 4096, %s99_s26, [#allocation5 + $0x2]  ;;  %vm380_vm6 = vcmask 1043456   ;;  %v2743_v23 = vshrl.u32 %v103_v21, 7  ;;  %v378_v26 = vld [vmem:[#allocation6 + $0x1] sm:$0x3] }
 0x1c6   :  { %v379_v27 = vld [vmem:[#allocation6 + $0x3] sm:$0x3] }
 0x1c7   :  { %v2746_v24 = vsub.s32 0, %v2743_v23  ;;  %v2749_v25 = vsub.s32 1, %v2743_v23 }
 0x1c9   :  { %v428_v28 = vrot.slane %v378_v26, %v2746_v24  ;;  %v432_v30 = vrot.slane %v378_v26, %v2749_v25  ;;  %v441_v33 = vrot.slane %v379_v27, %v2746_v24  ;;  %v445_v34 = vrot.slane %v379_v27, %v2749_v25 }
 0x26f   :  { %v371_v44 = vpop.f32.mrb[0].mxu1 }
 0x270   :  { %v381_v45 = vsel %vm380_vm6, %v371_v44, 0.0  ;;  %v373_v46 = vpop.f32.mrb[1].mxu1 }
 0x271   :  { %v382_v47 = vrot.slane %v381_v45, 4  ;;  %v388_v48 = vsel %vm380_vm6, %v373_v46, 0.0  ;;  %v375_v49 = vpop.f32.mrb[2].mxu1 }
 0x272   :  { %v389_v50 = vrot.slane %v388_v48, 4  ;;  %v376_v51 = vpop.f32.mrb[3].mxu1 }
 0x273   :  { %v383_v52 = vadd.f32 %v382_v47, %v381_v45 }
 0x274   :  { %v390_v53 = vadd.f32 %v389_v50, %v388_v48 }
 0x275   :  { %v384_v54 = vrot.slane %v383_v52, 2 }
 0x276   :  { %v391_v55 = vrot.slane %v390_v53, 2 }
 0x277   :  { %v385_v56 = vadd.f32 %v384_v54, %v383_v52 }
 0x278   :  { %v392_v57 = vadd.f32 %v391_v55, %v390_v53 }
 0x279   :  { %v386_v58 = vrot.slane %v385_v56, 1 }
 0x27a   :  { %v393_v59 = vrot.slane %v392_v57, 1 }
 0x27b   :  { %v387_v60 = vadd.f32 %v386_v58, %v385_v56 }
 0x27c   :  { %v394_v61 = vadd.f32 %v393_v59, %v392_v57 }
 0x27d   :  { %v396_v62 = vmul.f32 0.25, %v387_v60 }
 0x27e   :  { %v397_v63 = vmul.f32 0.25, %v394_v61 }
 0x27f   :  { %v398_v0 = vsub.f32 %v371_v44, %v396_v62 }
 0x280   :  { %v399_v1 = vsub.f32 %v373_v46, %v397_v63 }
 0x281   :  { %v400_v2 = vmul.f32 %v398_v0, %v398_v0 }
 0x282   :  { %v401_v3 = vmul.f32 %v399_v1, %v399_v1 }
 0x283   :  { %v402_v4 = vsel %vm380_vm6, %v400_v2, 0.0 }
 0x284   :  { %v403_v5 = vrot.slane %v402_v4, 4  ;;  %v409_v6 = vsel %vm380_vm6, %v401_v3, 0.0 }
 0x285   :  { %v410_v7 = vrot.slane %v409_v6, 4 }
 0x286   :  { %v404_v8 = vadd.f32 %v403_v5, %v402_v4 }
 0x287   :  { %v411_v9 = vadd.f32 %v410_v7, %v409_v6 }
 0x288   :  { %v405_v10 = vrot.slane %v404_v8, 2 }
 0x289   :  { %v412_v11 = vrot.slane %v411_v9, 2 }
 0x28a   :  { %v406_v12 = vadd.f32 %v405_v10, %v404_v8 }
 0x28b   :  { %v413_v13 = vadd.f32 %v412_v11, %v411_v9 }
 0x28c   :  { %v407_v14 = vrot.slane %v406_v12, 1 }
 0x28d   :  { %v414_v15 = vrot.slane %v413_v13, 1 }
 0x28e   :  { %v408_v16 = vadd.f32 %v407_v14, %v406_v12 }
 0x28f   :  { %v415_v17 = vadd.f32 %v414_v15, %v413_v13 }
 0x290   :  { %v416_v18 = vmul.f32 0.25, %v408_v16 }
 0x291   :  { %v417_v19 = vmul.f32 0.25, %v415_v17 }
 0x292   :  { %v418_v20 = vadd.f32 0.8, %v416_v18 }
 0x293   :  { %v419_v22 = vadd.f32 0.8, %v417_v19 }
 0x294   :  { %2391 = vrsqrt.f32 %v418_v20 }
 0x295   :  { %2393 = vrsqrt.f32 %v419_v22 }
 0x29e   :  { %v2392_v29 = vpop.eup %2391 }
 0x29f   :  { %v2394_v31 = vpop.eup %2393  ;;  %v422_v32 = vmul.f32 %v2392_v29, %v398_v0 }
 0x2a0   :  { %v423_v21 = vmul.f32 %v2394_v31, %v399_v1 }
 0x2a1   :  { %v435_v35 = vmul.f32 %v428_v28, %v422_v32 }
 0x2a2   :  { %v436_v36 = vmul.f32 %v432_v30, %v423_v21 }
 0x2a3   :  { %v448_v37 = vadd.f32 %v441_v33, %v435_v35 }
 0x2a4   :  { %v449_v38 = vadd.f32 %v445_v34, %v436_v36 }
 0x2a5   :  { %vm450_vm7 = vcmp.ge.f32.partialorder %v448_v37, 0.0  ;;  %v452_v39 = vmul.f32 0.2, %v448_v37 }
 0x2a6   :  { %vm451_vm8 = vcmp.ge.f32.partialorder %v449_v38, 0.0  ;;  %v453_v40 = vmul.f32 0.2, %v449_v38 }
 0x2a7   :  { %v2755_v41 = vsel %vm450_vm7, %v448_v37, %v452_v39 }
 0x2a8   :  { %v455_v42 = vsel %vm451_vm8, %v449_v38, %v453_v40 }
 0x2a9   :  { %2579 = dma.done.wait [#allocation5], 4096 }
 0x2aa   :  { %2580 = vsyncadd [#allocation5], 4294963200  ;;  %v461_v43 = vpack.c.bf16 %v455_v42, %v455_v42  ;;  %v463_v44 = vld [vmem:[#allocation2 + $0x8] sm:$0xff]  ;;  %v465_v45 = vld [vmem:[#allocation2 + $0x18] sm:$0xff] }
 0x2ab   :  { %v462_v46 = vld [vmem:[#allocation2] sm:$0xff]  ;;  %v495_v47 = vunpack.c.l.s8.bf16 %v463_v44  ;;  %v499_v48 = vunpack.c.h.s8.bf16 %v463_v44  ;;  %v497_v49 = vunpack.c.l.s8.bf16 %v465_v45  ;;  %v501_v50 = vunpack.c.h.s8.bf16 %v465_v45  ;;  %v464_v51 = vld [vmem:[#allocation2 + $0x10] sm:$0xff]  ;;  %v467_v54 = vld [vmem:[#allocation2 + $0x28] sm:$0xff] }
 0x2ac   :  { %590 = vmatprep.mubr.bf16.mxu0 %v461_v43  ;;  %631 = vmatprep.mubr.bf16.mxu1 %v461_v43  ;;  %v494_v52 = vunpack.c.l.s8.bf16 %v462_v46  ;;  %v496_v53 = vunpack.c.l.s8.bf16 %v464_v51  ;;  %v469_v55 = vld [vmem:[#allocation2 + $0x38] sm:$0xff]  ;;  %v498_v56 = vunpack.c.h.s8.bf16 %v462_v46  ;;  %v500_v57 = vunpack.c.h.s8.bf16 %v464_v51  ;;  %v466_v60 = vld [vmem:[#allocation2 + $0x20] sm:$0xff]  ;;  %v468_v61 = vld [vmem:[#allocation2 + $0x30] sm:$0xff] }
 0x2ad   :  { %558 = vmatprep.subr.bf16.mxu0 %v495_v47  ;;  %599 = vmatprep.subr.bf16.mxu1 %v497_v49  ;;  %v503_v58 = vunpack.c.l.s8.bf16 %v467_v54  ;;  %v505_v59 = vunpack.c.l.s8.bf16 %v469_v55  ;;  %v502_v62 = vunpack.c.l.s8.bf16 %v466_v60  ;;  %v504_v63 = vunpack.c.l.s8.bf16 %v468_v61  ;;  %v471_v2 = vld [vmem:[#allocation2 + $0x48] sm:$0xff]  ;;  %v473_v3 = vld [vmem:[#allocation2 + $0x58] sm:$0xff]  ;;  %v470_v8 = vld [vmem:[#allocation2 + $0x40] sm:$0xff] }
 0x2ae   :  { %559 = vmatpush1.bf16.msra.mxu0 %v494_v52  ;;  %600 = vmatpush1.bf16.msra.mxu1 %v496_v53  ;;  %v507_v0 = vunpack.c.h.s8.bf16 %v467_v54  ;;  %v509_v1 = vunpack.c.h.s8.bf16 %v469_v55  ;;  %v506_v4 = vunpack.c.h.s8.bf16 %v466_v60  ;;  %v508_v5 = vunpack.c.h.s8.bf16 %v468_v61  ;;  %v472_v9 = vld [vmem:[#allocation2 + $0x50] sm:$0xff]  ;;  %v475_v14 = vld [vmem:[#allocation2 + $0x68] sm:$0xff]  ;;  %v477_v15 = vld [vmem:[#allocation2 + $0x78] sm:$0xff] }
 0x2af   :  { %560 = vmatprep.subr.bf16.mxu0 %v499_v48  ;;  %601 = vmatprep.subr.bf16.mxu1 %v501_v50  ;;  %v511_v6 = vunpack.c.l.s8.bf16 %v471_v2  ;;  %v513_v7 = vunpack.c.l.s8.bf16 %v473_v3  ;;  %v510_v10 = vunpack.c.l.s8.bf16 %v470_v8  ;;  %v512_v11 = vunpack.c.l.s8.bf16 %v472_v9  ;;  %v474_v20 = vld [vmem:[#allocation2 + $0x60] sm:$0xff]  ;;  %v476_v22 = vld [vmem:[#allocation2 + $0x70] sm:$0xff]  ;;  %v479_v30 = vld [vmem:[#allocation2 + $0x88] sm:$0xff] }
 0x2b0   :  { %v515_v12 = vunpack.c.h.s8.bf16 %v471_v2  ;;  %v517_v13 = vunpack.c.h.s8.bf16 %v473_v3  ;;  %v514_v16 = vunpack.c.h.s8.bf16 %v470_v8  ;;  %v516_v17 = vunpack.c.h.s8.bf16 %v472_v9  ;;  %v481_v31 = vld [vmem:[#allocation2 + $0x98] sm:$0xff]  ;;  %v478_v35 = vld [vmem:[#allocation2 + $0x80] sm:$0xff]  ;;  %v480_v36 = vld [vmem:[#allocation2 + $0x90] sm:$0xff] }
 0x2b1   :  { %v519_v18 = vunpack.c.l.s8.bf16 %v475_v14  ;;  %v521_v19 = vunpack.c.l.s8.bf16 %v477_v15  ;;  %v518_v26 = vunpack.c.l.s8.bf16 %v474_v20  ;;  %v520_v27 = vunpack.c.l.s8.bf16 %v476_v22  ;;  %v483_v42 = vld [vmem:[#allocation2 + $0xa8] sm:$0xff]  ;;  %v485_v43 = vld [vmem:[#allocation2 + $0xb8] sm:$0xff]  ;;  %v482_v48 = vld [vmem:[#allocation2 + $0xa0] sm:$0xff] }
 0x2b2   :  { %561 = vmatpush1.bf16.msra.mxu0 %v498_v56  ;;  %602 = vmatpush1.bf16.msra.mxu1 %v500_v57  ;;  %v523_v28 = vunpack.c.h.s8.bf16 %v475_v14  ;;  %v525_v29 = vunpack.c.h.s8.bf16 %v477_v15  ;;  %v522_v32 = vunpack.c.h.s8.bf16 %v474_v20  ;;  %v524_v33 = vunpack.c.h.s8.bf16 %v476_v22  ;;  %v484_v49 = vld [vmem:[#allocation2 + $0xb0] sm:$0xff]  ;;  %v487_v54 = vld [vmem:[#allocation2 + $0xc8] sm:$0xff]  ;;  %v489_v55 = vld [vmem:[#allocation2 + $0xd8] sm:$0xff] }
 0x2b3   :  { %562 = vmatprep.subr.bf16.mxu0 %v503_v58  ;;  %603 = vmatprep.subr.bf16.mxu1 %v505_v59  ;;  %v527_v21 = vunpack.c.l.s8.bf16 %v479_v30  ;;  %v529_v34 = vunpack.c.l.s8.bf16 %v481_v31  ;;  %v526_v37 = vunpack.c.l.s8.bf16 %v478_v35  ;;  %v528_v38 = vunpack.c.l.s8.bf16 %v480_v36  ;;  %v486_v60 = vld [vmem:[#allocation2 + $0xc0] sm:$0xff]  ;;  %v488_v61 = vld [vmem:[#allocation2 + $0xd0] sm:$0xff]  ;;  %v491_v2 = vld [vmem:[#allocation2 + $0xe8] sm:$0xff] }
 0x2b4   :  { %v531_v39 = vunpack.c.h.s8.bf16 %v479_v30  ;;  %v533_v40 = vunpack.c.h.s8.bf16 %v481_v31  ;;  %v530_v44 = vunpack.c.h.s8.bf16 %v478_v35  ;;  %v532_v45 = vunpack.c.h.s8.bf16 %v480_v36  ;;  %v493_v3 = vld [vmem:[#allocation2 + $0xf8] sm:$0xff]  ;;  %v490_v8 = vld [vmem:[#allocation2 + $0xe0] sm:$0xff]  ;;  %v492_v9 = vld [vmem:[#allocation2 + $0xf0] sm:$0xff] }
 0x2b5   :  { %v535_v46 = vunpack.c.l.s8.bf16 %v483_v42  ;;  %v537_v47 = vunpack.c.l.s8.bf16 %v485_v43  ;;  %v534_v50 = vunpack.c.l.s8.bf16 %v482_v48  ;;  %v536_v51 = vunpack.c.l.s8.bf16 %v484_v49 }
 0x2b6   :  { %563 = vmatpush1.bf16.msra.mxu0 %v502_v62  ;;  %604 = vmatpush1.bf16.msra.mxu1 %v504_v63  ;;  %v539_v52 = vunpack.c.h.s8.bf16 %v483_v42  ;;  %v541_v53 = vunpack.c.h.s8.bf16 %v485_v43  ;;  %v538_v56 = vunpack.c.h.s8.bf16 %v482_v48  ;;  %v540_v57 = vunpack.c.h.s8.bf16 %v484_v49 }
 0x2b7   :  { %564 = vmatprep.subr.bf16.mxu0 %v507_v0  ;;  %605 = vmatprep.subr.bf16.mxu1 %v509_v1  ;;  %v543_v58 = vunpack.c.l.s8.bf16 %v487_v54  ;;  %v545_v59 = vunpack.c.l.s8.bf16 %v489_v55  ;;  %v542_v62 = vunpack.c.l.s8.bf16 %v486_v60  ;;  %v544_v63 = vunpack.c.l.s8.bf16 %v488_v61 }
 0x2b8   :  { %v547_v0 = vunpack.c.h.s8.bf16 %v487_v54  ;;  %v549_v1 = vunpack.c.h.s8.bf16 %v489_v55  ;;  %v554_v14 = vunpack.c.h.s8.bf16 %v490_v8  ;;  %v556_v15 = vunpack.c.h.s8.bf16 %v492_v9 }
 0x2ba   :  { %565 = vmatpush1.bf16.msra.mxu0 %v506_v4  ;;  %606 = vmatpush1.bf16.msra.mxu1 %v508_v5  ;;  %v546_v4 = vunpack.c.h.s8.bf16 %v486_v60  ;;  %v548_v5 = vunpack.c.h.s8.bf16 %v488_v61 }
 0x2bb   :  { %566 = vmatprep.subr.bf16.mxu0 %v511_v6  ;;  %607 = vmatprep.subr.bf16.mxu1 %v513_v7  ;;  %v551_v6 = vunpack.c.l.s8.bf16 %v491_v2  ;;  %v553_v7 = vunpack.c.l.s8.bf16 %v493_v3 }
 0x2be   :  { %567 = vmatpush1.bf16.msra.mxu0 %v510_v10  ;;  %608 = vmatpush1.bf16.msra.mxu1 %v512_v11  ;;  %v550_v10 = vunpack.c.l.s8.bf16 %v490_v8  ;;  %v552_v11 = vunpack.c.l.s8.bf16 %v492_v9 }
 0x2bf   :  { %568 = vmatprep.subr.bf16.mxu0 %v515_v12  ;;  %609 = vmatprep.subr.bf16.mxu1 %v517_v13  ;;  %v555_v12 = vunpack.c.h.s8.bf16 %v491_v2  ;;  %v557_v13 = vunpack.c.h.s8.bf16 %v493_v3 }
 0x2c2   :  { %569 = vmatpush1.bf16.msra.mxu0 %v514_v16  ;;  %610 = vmatpush1.bf16.msra.mxu1 %v516_v17  ;;  %v460_v16 = vpack.c.bf16 %v2755_v41, %v2755_v41  ;;  %v2760_v17 = vsub.s32 2, %v2743_v23 }
 0x2c3   :  { %570 = vmatprep.subr.bf16.mxu0 %v519_v18  ;;  %611 = vmatprep.subr.bf16.mxu1 %v521_v19  ;;  %v640_v18 = vld [vmem:[#allocation6 + $0xd] sm:$0xf]  ;;  %v2763_v19 = vsub.s32 3, %v2743_v23 }
 0x2c4   :  { %v645_v20 = vrot.slane %v640_v18, %v2746_v24  ;;  %v653_v22 = vrot.slane %v640_v18, %v2760_v17 }
 0x2c6   :  { %571 = vmatpush1.bf16.msra.mxu0 %v518_v26  ;;  %612 = vmatpush1.bf16.msra.mxu1 %v520_v27  ;;  %v649_v26 = vrot.slane %v640_v18, %v2749_v25  ;;  %v657_v27 = vrot.slane %v640_v18, %v2763_v19 }
 0x2c7   :  { %572 = vmatprep.subr.bf16.mxu0 %v523_v28  ;;  %613 = vmatprep.subr.bf16.mxu1 %v525_v29 }
 0x2ca   :  { %573 = vmatpush1.bf16.msra.mxu0 %v522_v32  ;;  %614 = vmatpush1.bf16.msra.mxu1 %v524_v33 }
 0x2cb   :  { %574 = vmatprep.subr.bf16.mxu0 %v527_v21  ;;  %615 = vmatprep.subr.bf16.mxu1 %v529_v34 }
 0x2ce   :  { %575 = vmatpush1.bf16.msra.mxu0 %v526_v37  ;;  %616 = vmatpush1.bf16.msra.mxu1 %v528_v38 }
 0x2cf   :  { %576 = vmatprep.subr.bf16.mxu0 %v531_v39  ;;  %617 = vmatprep.subr.bf16.mxu1 %v533_v40 }
 0x2d2   :  { %577 = vmatpush1.bf16.msra.mxu0 %v530_v44  ;;  %618 = vmatpush1.bf16.msra.mxu1 %v532_v45 }
 0x2d3   :  { %578 = vmatprep.subr.bf16.mxu0 %v535_v46  ;;  %619 = vmatprep.subr.bf16.mxu1 %v537_v47 }
 0x2d6   :  { %579 = vmatpush1.bf16.msra.mxu0 %v534_v50  ;;  %620 = vmatpush1.bf16.msra.mxu1 %v536_v51 }
 0x2d7   :  { %580 = vmatprep.subr.bf16.mxu0 %v539_v52  ;;  %621 = vmatprep.subr.bf16.mxu1 %v541_v53 }
 0x2da   :  { %581 = vmatpush1.bf16.msra.mxu0 %v538_v56  ;;  %622 = vmatpush1.bf16.msra.mxu1 %v540_v57 }
 0x2db   :  { %582 = vmatprep.subr.bf16.mxu0 %v543_v58  ;;  %623 = vmatprep.subr.bf16.mxu1 %v545_v59 }
 0x2de   :  { %583 = vmatpush1.bf16.msra.mxu0 %v542_v62  ;;  %624 = vmatpush1.bf16.msra.mxu1 %v544_v63 }
 0x2df   :  { %584 = vmatprep.subr.bf16.mxu0 %v547_v0  ;;  %625 = vmatprep.subr.bf16.mxu1 %v549_v1 }
 0x2e2   :  { %585 = vmatpush1.bf16.msra.mxu0 %v546_v4  ;;  %626 = vmatpush1.bf16.msra.mxu1 %v548_v5 }
 0x2e3   :  { %586 = vmatprep.subr.bf16.mxu0 %v551_v6  ;;  %627 = vmatprep.subr.bf16.mxu1 %v553_v7 }
 0x2e6   :  { %587 = vmatpush1.bf16.msra.mxu0 %v550_v10  ;;  %628 = vmatpush1.bf16.msra.mxu1 %v552_v11 }
 0x2e7   :  { %588 = vmatprep.subr.bf16.mxu0 %v555_v12  ;;  %629 = vmatprep.subr.bf16.mxu1 %v557_v13 }
 0x2ea   :  { %589 = vmatpush1.bf16.msra.mxu0 %v554_v14  ;;  %630 = vmatpush1.bf16.msra.mxu1 %v556_v15 }
 0x2ed   :  { %591 = vmatmul.mubr.bf16.vlgmr.msra.gmra.mrb[8].mxu0 %v460_v16  ;;  %632 = vmatmul.mubr.bf16.vlgmr.msra.gmra.mrb[4].mxu1 %v460_v16 }
 0x3c0   :  { %v592_v41 = vpop.f32.mrb[8].mxu0  ;;  %v633_v28 = vpop.f32.mrb[4].mxu1 }
 0x3c1   :  { %v662_v29 = vmul.f32 %v645_v20, %v592_v41  ;;  %v664_v30 = vmul.f32 %v653_v22, %v633_v28  ;;  %v594_v31 = vpop.f32.mrb[9].mxu0  ;;  %v635_v32 = vpop.f32.mrb[5].mxu1 }
 0x3c2   :  { %v663_v33 = vmul.f32 %v649_v26, %v594_v31  ;;  %v665_v21 = vmul.f32 %v657_v27, %v635_v32  ;;  %v596_v34 = vpop.f32.mrb[10].mxu0  ;;  %v637_v35 = vpop.f32.mrb[6].mxu1 }
 0x3c3   :  { %v668_v36 = vsel %vm380_vm6, %v662_v29, 0.0  ;;  %v682_v37 = vsel %vm380_vm6, %v664_v30, 0.0  ;;  %v597_v38 = vpop.f32.mrb[11].mxu0  ;;  %v638_v39 = vpop.f32.mrb[7].mxu1 }
 0x3c4   :  { %v669_v40 = vrot.slane %v668_v36, 4  ;;  %v683_v42 = vrot.slane %v682_v37, 4  ;;  %v675_v43 = vsel %vm380_vm6, %v663_v33, 0.0  ;;  %v689_v44 = vsel %vm380_vm6, %v665_v21, 0.0 }
 0x3c5   :  { %v676_v45 = vrot.slane %v675_v43, 4  ;;  %v690_v46 = vrot.slane %v689_v44, 4 }
 0x3c6   :  { %v670_v47 = vadd.f32 %v669_v40, %v668_v36  ;;  %v684_v48 = vadd.f32 %v683_v42, %v682_v37 }
 0x3c7   :  { %v677_v49 = vadd.f32 %v676_v45, %v675_v43  ;;  %v691_v50 = vadd.f32 %v690_v46, %v689_v44 }
 0x3c8   :  { %v671_v51 = vrot.slane %v670_v47, 2  ;;  %v685_v52 = vrot.slane %v684_v48, 2 }
 0x3c9   :  { %v678_v53 = vrot.slane %v677_v49, 2  ;;  %v692_v54 = vrot.slane %v691_v50, 2 }
 0x3ca   :  { %v672_v55 = vadd.f32 %v671_v51, %v670_v47  ;;  %v686_v56 = vadd.f32 %v685_v52, %v684_v48 }
 0x3cb   :  { %v679_v57 = vadd.f32 %v678_v53, %v677_v49  ;;  %v693_v58 = vadd.f32 %v692_v54, %v691_v50 }
 0x3cc   :  { %v673_v59 = vrot.slane %v672_v55, 1  ;;  %v687_v60 = vrot.slane %v686_v56, 1 }
 0x3cd   :  { %v680_v61 = vrot.slane %v679_v57, 1  ;;  %v694_v62 = vrot.slane %v693_v58, 1 }
 0x3ce   :  { %v674_v63 = vadd.f32 %v673_v59, %v672_v55  ;;  %v688_v0 = vadd.f32 %v687_v60, %v686_v56  ;;  %v666_v56 = vld [vmem:[#allocation6 + $0x5] sm:$0xf] }
 0x3cf   :  { %v681_v1 = vadd.f32 %v680_v61, %v679_v57  ;;  %v695_v2 = vadd.f32 %v694_v62, %v693_v58  ;;  %v667_v57 = vld [vmem:[#allocation6 + $0x9] sm:$0xf]  ;;  %v756_v58 = vrot.slane %v666_v56, %v2746_v24  ;;  %v764_v60 = vrot.slane %v666_v56, %v2760_v17 }
 0x3d0   :  { %v696_v3 = vmul.f32 0.25, %v674_v63  ;;  %v698_v4 = vmul.f32 0.25, %v688_v0  ;;  %v781_v63 = vrot.slane %v667_v57, %v2746_v24  ;;  %v760_v0 = vrot.slane %v666_v56, %v2749_v25 }
 0x3d1   :  { %v697_v5 = vmul.f32 0.25, %v681_v1  ;;  %v699_v6 = vmul.f32 0.25, %v695_v2 }
 0x3d2   :  { %v700_v7 = vsub.f32 %v662_v29, %v696_v3  ;;  %v702_v8 = vsub.f32 %v664_v30, %v698_v4  ;;  %v789_v3 = vrot.slane %v667_v57, %v2760_v17  ;;  %v768_v4 = vrot.slane %v666_v56, %v2763_v19 }
 0x3d3   :  { %v701_v9 = vsub.f32 %v663_v33, %v697_v5  ;;  %v2773_v10 = vsub.f32 %v665_v21, %v699_v6 }
 0x3d4   :  { %v704_v11 = vmul.f32 %v700_v7, %v700_v7  ;;  %v706_v12 = vmul.f32 %v702_v8, %v702_v8 }
 0x3d5   :  { %v705_v13 = vmul.f32 %v701_v9, %v701_v9  ;;  %v707_v14 = vmul.f32 %v2773_v10, %v2773_v10 }
 0x3d6   :  { %v708_v15 = vsel %vm380_vm6, %v704_v11, 0.0  ;;  %v722_v16 = vsel %vm380_vm6, %v706_v12, 0.0  ;;  %v785_v12 = vrot.slane %v667_v57, %v2749_v25 }
 0x3d7   :  { %v709_v18 = vrot.slane %v708_v15, 4  ;;  %v723_v20 = vrot.slane %v722_v16, 4  ;;  %v715_v22 = vsel %vm380_vm6, %v705_v13, 0.0  ;;  %v729_v26 = vsel %vm380_vm6, %v707_v14, 0.0 }
 0x3d8   :  { %v716_v27 = vrot.slane %v715_v22, 4  ;;  %v730_v41 = vrot.slane %v729_v26, 4 }
 0x3d9   :  { %v710_v28 = vadd.f32 %v709_v18, %v708_v15  ;;  %v724_v29 = vadd.f32 %v723_v20, %v722_v16 }
 0x3da   :  { %v717_v30 = vadd.f32 %v716_v27, %v715_v22  ;;  %v731_v31 = vadd.f32 %v730_v41, %v729_v26 }
 0x3db   :  { %v711_v32 = vrot.slane %v710_v28, 2  ;;  %v725_v33 = vrot.slane %v724_v29, 2 }
 0x3dc   :  { %v718_v21 = vrot.slane %v717_v30, 2  ;;  %v732_v34 = vrot.slane %v731_v31, 2 }
 0x3dd   :  { %v712_v35 = vadd.f32 %v711_v32, %v710_v28  ;;  %v726_v36 = vadd.f32 %v725_v33, %v724_v29 }
 0x3de   :  { %v719_v37 = vadd.f32 %v718_v21, %v717_v30  ;;  %v733_v38 = vadd.f32 %v732_v34, %v731_v31 }
 0x3df   :  { %v713_v39 = vrot.slane %v712_v35, 1  ;;  %v727_v40 = vrot.slane %v726_v36, 1 }
 0x3e0   :  { %v720_v42 = vrot.slane %v719_v37, 1  ;;  %v734_v43 = vrot.slane %v733_v38, 1 }
 0x3e1   :  { %v714_v44 = vadd.f32 %v713_v39, %v712_v35  ;;  %v728_v45 = vadd.f32 %v727_v40, %v726_v36 }
 0x3e2   :  { %v721_v46 = vadd.f32 %v720_v42, %v719_v37  ;;  %v735_v47 = vadd.f32 %v734_v43, %v733_v38 }
 0x3e3   :  { %v736_v48 = vmul.f32 0.25, %v714_v44  ;;  %v738_v49 = vmul.f32 0.25, %v728_v45 }
 0x3e4   :  { %v737_v50 = vmul.f32 0.25, %v721_v46  ;;  %v739_v51 = vmul.f32 0.25, %v735_v47 }
 0x3e5   :  { %v740_v52 = vadd.f32 0.8, %v736_v48  ;;  %v742_v53 = vadd.f32 0.8, %v738_v49 }
 0x3e6   :  { %v741_v54 = vadd.f32 0.8, %v737_v50  ;;  %v743_v55 = vadd.f32 0.8, %v739_v51 }
 0x3e7   :  { %2395 = vrsqrt.f32 %v740_v52 }
 0x3e8   :  { %2397 = vrsqrt.f32 %v742_v53 }
 0x3e9   :  { %2399 = vrsqrt.f32 %v741_v54 }
 0x3ea   :  { %2401 = vrsqrt.f32 %v743_v55 }
 0x3f1   :  { %v2396_v59 = vpop.eup %2395 }
 0x3f2   :  { %v2398_v61 = vpop.eup %2397  ;;  %v748_v62 = vmul.f32 %v2396_v59, %v700_v7  ;;  %v793_v7 = vrot.slane %v667_v57, %v2763_v19 }
 0x3f3   :  { %v2400_v1 = vpop.eup %2399  ;;  %v750_v2 = vmul.f32 %v2398_v61, %v702_v8 }
 0x3f4   :  { %v2402_v5 = vpop.eup %2401  ;;  %v773_v6 = vmul.f32 %v756_v58, %v748_v62  ;;  %v749_v11 = vmul.f32 %v2400_v1, %v701_v9 }
 0x3f5   :  { %v775_v13 = vmul.f32 %v764_v60, %v750_v2  ;;  %v751_v14 = vmul.f32 %v2402_v5, %v2773_v10 }
 0x3f6   :  { %v798_v15 = vadd.f32 %v781_v63, %v773_v6  ;;  %v774_v16 = vmul.f32 %v760_v0, %v749_v11 }
 0x3f7   :  { %v800_v18 = vadd.f32 %v789_v3, %v775_v13  ;;  %v776_v20 = vmul.f32 %v768_v4, %v751_v14 }
 0x3f8   :  { %vm802_vm9 = vcmp.ge.f32.partialorder %v798_v15, 0.0  ;;  %v806_v8 = vmul.f32 0.2, %v798_v15  ;;  %v799_v22 = vadd.f32 %v785_v12, %v774_v16 }
 0x3f9   :  { %vm804_vm10 = vcmp.ge.f32.partialorder %v800_v18, 0.0  ;;  %v808_v26 = vmul.f32 0.2, %v800_v18  ;;  %v801_v27 = vadd.f32 %v793_v7, %v776_v20 }
 0x3fa   :  { %v2790_v41 = vsel %vm802_vm9, %v798_v15, %v806_v8  ;;  %vm803_vm11 = vcmp.ge.f32.partialorder %v799_v22, 0.0  ;;  %v807_v9 = vmul.f32 0.2, %v799_v22 }
 0x3fb   :  { %v2792_v28 = vsel %vm804_vm10, %v800_v18, %v808_v26  ;;  %vm805_vm12 = vcmp.ge.f32.partialorder %v801_v27, 0.0  ;;  %v809_v10 = vmul.f32 0.2, %v801_v27 }
 0x3fc   :  { %v811_v29 = vsel %vm803_vm11, %v799_v22, %v807_v9 }
 0x3fd   :  { %v2794_v30 = vsel %vm805_vm12, %v801_v27, %v809_v10 }
 0x3fe   :  { %2581 = dma.done.wait [#allocation5 + $0x1], 16384 }
 0x3ff   :  { %2582 = vsyncadd [#allocation5 + $0x1], 4294950912  ;;  %v2796_v31 = vpack.c.bf16 %v811_v29, %v811_v29  ;;  %v823_v32 = vld [vmem:[#allocation3 + $0x8] sm:$0xff]  ;;  %v825_v33 = vld [vmem:[#allocation3 + $0x18] sm:$0xff] }
 0x400   :  { %v822_v21 = vld [vmem:[#allocation3] sm:$0xff]  ;;  %v951_v34 = vunpack.c.l.s8.bf16 %v823_v32  ;;  %v959_v35 = vunpack.c.h.s8.bf16 %v823_v32  ;;  %v953_v36 = vunpack.c.l.s8.bf16 %v825_v33  ;;  %v961_v37 = vunpack.c.h.s8.bf16 %v825_v33  ;;  %v824_v38 = vld [vmem:[#allocation3 + $0x10] sm:$0xff]  ;;  %v831_v42 = vld [vmem:[#allocation3 + $0x48] sm:$0xff] }
 0x401   :  { %1238 = vmatprep.mubr.bf16.mxu0 %v2796_v31  ;;  %1320 = vmatprep.mubr.bf16.mxu1 %v2796_v31  ;;  %v950_v39 = vunpack.c.l.s8.bf16 %v822_v21  ;;  %v952_v40 = vunpack.c.l.s8.bf16 %v824_v38  ;;  %v833_v43 = vld [vmem:[#allocation3 + $0x58] sm:$0xff]  ;;  %v958_v44 = vunpack.c.h.s8.bf16 %v822_v21  ;;  %v960_v45 = vunpack.c.h.s8.bf16 %v824_v38  ;;  %v830_v48 = vld [vmem:[#allocation3 + $0x40] sm:$0xff]  ;;  %v832_v49 = vld [vmem:[#allocation3 + $0x50] sm:$0xff] }
 0x402   :  { %1206 = vmatprep.subr.bf16.mxu0 %v951_v34  ;;  %1288 = vmatprep.subr.bf16.mxu1 %v953_v36  ;;  %v967_v46 = vunpack.c.l.s8.bf16 %v831_v42  ;;  %v969_v47 = vunpack.c.l.s8.bf16 %v833_v43  ;;  %v966_v50 = vunpack.c.l.s8.bf16 %v830_v48  ;;  %v968_v51 = vunpack.c.l.s8.bf16 %v832_v49  ;;  %v839_v54 = vld [vmem:[#allocation3 + $0x88] sm:$0xff]  ;;  %v841_v55 = vld [vmem:[#allocation3 + $0x98] sm:$0xff]  ;;  %v838_v60 = vld [vmem:[#allocation3 + $0x80] sm:$0xff] }
 0x403   :  { %1207 = vmatpush1.bf16.msra.mxu0 %v950_v39  ;;  %1289 = vmatpush1.bf16.msra.mxu1 %v952_v40  ;;  %v975_v52 = vunpack.c.h.s8.bf16 %v831_v42  ;;  %v977_v53 = vunpack.c.h.s8.bf16 %v833_v43  ;;  %v974_v56 = vunpack.c.h.s8.bf16 %v830_v48  ;;  %v976_v57 = vunpack.c.h.s8.bf16 %v832_v49  ;;  %v840_v61 = vld [vmem:[#allocation3 + $0x90] sm:$0xff]  ;;  %v847_v2 = vld [vmem:[#allocation3 + $0xc8] sm:$0xff]  ;;  %v849_v3 = vld [vmem:[#allocation3 + $0xd8] sm:$0xff] }
 0x404   :  { %1208 = vmatprep.subr.bf16.mxu0 %v959_v35  ;;  %1290 = vmatprep.subr.bf16.mxu1 %v961_v37  ;;  %v983_v58 = vunpack.c.l.s8.bf16 %v839_v54  ;;  %v985_v59 = vunpack.c.l.s8.bf16 %v841_v55  ;;  %v982_v62 = vunpack.c.l.s8.bf16 %v838_v60  ;;  %v984_v63 = vunpack.c.l.s8.bf16 %v840_v61  ;;  %v846_v12 = vld [vmem:[#allocation3 + $0xc0] sm:$0xff]  ;;  %v848_v13 = vld [vmem:[#allocation3 + $0xd0] sm:$0xff]  ;;  %v855_v18 = vld [vmem:[#allocation3 + $0x108] sm:$0xff] }
 0x405   :  { %v991_v0 = vunpack.c.h.s8.bf16 %v839_v54  ;;  %v993_v1 = vunpack.c.h.s8.bf16 %v841_v55  ;;  %v990_v4 = vunpack.c.h.s8.bf16 %v838_v60  ;;  %v992_v5 = vunpack.c.h.s8.bf16 %v840_v61  ;;  %v857_v20 = vld [vmem:[#allocation3 + $0x118] sm:$0xff]  ;;  %v854_v9 = vld [vmem:[#allocation3 + $0x100] sm:$0xff]  ;;  %v856_v10 = vld [vmem:[#allocation3 + $0x110] sm:$0xff] }
 0x406   :  { %v999_v6 = vunpack.c.l.s8.bf16 %v847_v2  ;;  %v1001_v11 = vunpack.c.l.s8.bf16 %v849_v3  ;;  %v998_v14 = vunpack.c.l.s8.bf16 %v846_v12  ;;  %v1000_v7 = vunpack.c.l.s8.bf16 %v848_v13  ;;  %v863_v34 = vld [vmem:[#allocation3 + $0x148] sm:$0xff]  ;;  %v865_v35 = vld [vmem:[#allocation3 + $0x158] sm:$0xff]  ;;  %v862_v40 = vld [vmem:[#allocation3 + $0x140] sm:$0xff] }
 0x407   :  { %1209 = vmatpush1.bf16.msra.mxu0 %v958_v44  ;;  %1291 = vmatpush1.bf16.msra.mxu1 %v960_v45  ;;  %v1007_v15 = vunpack.c.h.s8.bf16 %v847_v2  ;;  %v1009_v16 = vunpack.c.h.s8.bf16 %v849_v3  ;;  %v1006_v8 = vunpack.c.h.s8.bf16 %v846_v12  ;;  %v1008_v22 = vunpack.c.h.s8.bf16 %v848_v13  ;;  %v864_v42 = vld [vmem:[#allocation3 + $0x150] sm:$0xff]  ;;  %v873_v48 = vld [vmem:[#allocation3 + $0x198] sm:$0xff] }
 0x408   :  { %1210 = vmatprep.subr.bf16.mxu0 %v967_v46  ;;  %1292 = vmatprep.subr.bf16.mxu1 %v969_v47  ;;  %v1015_v26 = vunpack.c.l.s8.bf16 %v855_v18  ;;  %v1017_v27 = vunpack.c.l.s8.bf16 %v857_v20  ;;  %v1014_v29 = vunpack.c.l.s8.bf16 %v854_v9  ;;  %v1016_v32 = vunpack.c.l.s8.bf16 %v856_v10  ;;  %v871_v47 = vld [vmem:[#allocation3 + $0x188] sm:$0xff]  ;;  %v872_v54 = vld [vmem:[#allocation3 + $0x190] sm:$0xff]  ;;  %v881_v60 = vld [vmem:[#allocation3 + $0x1d8] sm:$0xff] }
 0x409   :  { %v1023_v33 = vunpack.c.h.s8.bf16 %v855_v18  ;;  %v1025_v21 = vunpack.c.h.s8.bf16 %v857_v20  ;;  %v1022_v36 = vunpack.c.h.s8.bf16 %v854_v9  ;;  %v1024_v37 = vunpack.c.h.s8.bf16 %v856_v10  ;;  %v880_v2 = vld [vmem:[#allocation3 + $0x1d0] sm:$0xff]  ;;  %v889_v12 = vld [vmem:[#allocation3 + $0x218] sm:$0xff]  ;;  %v895_v9 = vld [vmem:[#allocation3 + $0x248] sm:$0xff] }
 0x40a   :  { %v1031_v38 = vunpack.c.l.s8.bf16 %v863_v34  ;;  %v1033_v39 = vunpack.c.l.s8.bf16 %v865_v35  ;;  %v1030_v43 = vunpack.c.l.s8.bf16 %v862_v40  ;;  %v1032_v44 = vunpack.c.l.s8.bf16 %v864_v42  ;;  %v888_v18 = vld [vmem:[#allocation3 + $0x210] sm:$0xff]  ;;  %v897_v10 = vld [vmem:[#allocation3 + $0x258] sm:$0xff] }
 0x40b   :  { %1211 = vmatpush1.bf16.msra.mxu0 %v966_v50  ;;  %1293 = vmatpush1.bf16.msra.mxu1 %v968_v51  ;;  %v1039_v45 = vunpack.c.h.s8.bf16 %v863_v34  ;;  %v1041_v46 = vunpack.c.h.s8.bf16 %v865_v35  ;;  %v1038_v49 = vunpack.c.h.s8.bf16 %v862_v40  ;;  %v1040_v50 = vunpack.c.h.s8.bf16 %v864_v42  ;;  %v894_v34 = vld [vmem:[#allocation3 + $0x240] sm:$0xff]  ;;  %v896_v35 = vld [vmem:[#allocation3 + $0x250] sm:$0xff]  ;;  %v905_v40 = vld [vmem:[#allocation3 + $0x298] sm:$0xff] }
 0x40c   :  { %1212 = vmatprep.subr.bf16.mxu0 %v975_v52  ;;  %1294 = vmatprep.subr.bf16.mxu1 %v977_v53  ;;  %v1047_v51 = vunpack.c.l.s8.bf16 %v871_v47  ;;  %v1049_v52 = vunpack.c.l.s8.bf16 %v873_v48  ;;  %v870_v53 = vld [vmem:[#allocation3 + $0x180] sm:$0xff]  ;;  %v2802_v20 = vpack.c.bf16 %v2790_v41, %v2790_v41  ;;  %v1102_v42 = vunpack.c.h.s8.bf16 %v894_v34 }
 0x40d   :  { %v1046_v55 = vunpack.c.l.s8.bf16 %v870_v53  ;;  %v1054_v61 = vunpack.c.h.s8.bf16 %v870_v53  ;;  %v913_v53 = vld [vmem:[#allocation3 + $0x2d8] sm:$0xff] }
 0x40f   :  { %1213 = vmatpush1.bf16.msra.mxu0 %v974_v56  ;;  %1295 = vmatpush1.bf16.msra.mxu1 %v976_v57  ;;  %v1048_v56 = vunpack.c.l.s8.bf16 %v872_v54  ;;  %v1055_v57 = vunpack.c.h.s8.bf16 %v871_v47  ;;  %v904_v47 = vld [vmem:[#allocation3 + $0x290] sm:$0xff] }
 0x410   :  { %1214 = vmatprep.subr.bf16.mxu0 %v983_v58  ;;  %1296 = vmatprep.subr.bf16.mxu1 %v985_v59  ;;  %v1057_v58 = vunpack.c.h.s8.bf16 %v873_v48  ;;  %v879_v59 = vld [vmem:[#allocation3 + $0x1c8] sm:$0xff] }
 0x413   :  { %1215 = vmatpush1.bf16.msra.mxu0 %v982_v62  ;;  %1297 = vmatpush1.bf16.msra.mxu1 %v984_v63  ;;  %v1056_v62 = vunpack.c.h.s8.bf16 %v872_v54  ;;  %v1063_v63 = vunpack.c.l.s8.bf16 %v879_v59 }
 0x414   :  { %1216 = vmatprep.subr.bf16.mxu0 %v991_v0  ;;  %1298 = vmatprep.subr.bf16.mxu1 %v993_v1  ;;  %v1065_v0 = vunpack.c.l.s8.bf16 %v881_v60  ;;  %v878_v1 = vld [vmem:[#allocation3 + $0x1c0] sm:$0xff] }
 0x415   :  { %v1062_v3 = vunpack.c.l.s8.bf16 %v878_v1  ;;  %v1070_v13 = vunpack.c.h.s8.bf16 %v878_v1  ;;  %v921_v1 = vld [vmem:[#allocation3 + $0x318] sm:$0xff] }
 0x417   :  { %1217 = vmatpush1.bf16.msra.mxu0 %v990_v4  ;;  %1299 = vmatpush1.bf16.msra.mxu1 %v992_v5  ;;  %v1064_v4 = vunpack.c.l.s8.bf16 %v880_v2  ;;  %v1071_v5 = vunpack.c.h.s8.bf16 %v879_v59  ;;  %v912_v59 = vld [vmem:[#allocation3 + $0x2d0] sm:$0xff] }
 0x418   :  { %1218 = vmatprep.subr.bf16.mxu0 %v999_v6  ;;  %1300 = vmatprep.subr.bf16.mxu1 %v1001_v11  ;;  %v1073_v6 = vunpack.c.h.s8.bf16 %v881_v60  ;;  %v887_v11 = vld [vmem:[#allocation3 + $0x208] sm:$0xff] }
 0x41b   :  { %1219 = vmatpush1.bf16.msra.mxu0 %v998_v14  ;;  %1301 = vmatpush1.bf16.msra.mxu1 %v1000_v7  ;;  %v1072_v14 = vunpack.c.h.s8.bf16 %v880_v2  ;;  %v1079_v7 = vunpack.c.l.s8.bf16 %v887_v11 }
 0x41c   :  { %1220 = vmatprep.subr.bf16.mxu0 %v1007_v15  ;;  %1302 = vmatprep.subr.bf16.mxu1 %v1009_v16  ;;  %v1081_v15 = vunpack.c.l.s8.bf16 %v889_v12  ;;  %v886_v16 = vld [vmem:[#allocation3 + $0x200] sm:$0xff] }
 0x41d   :  { %v1086_v41 = vunpack.c.h.s8.bf16 %v886_v16 }
 0x41f   :  { %1221 = vmatpush1.bf16.msra.mxu0 %v1006_v8  ;;  %1303 = vmatpush1.bf16.msra.mxu1 %v1008_v22  ;;  %v1078_v8 = vunpack.c.l.s8.bf16 %v886_v16  ;;  %v1080_v22 = vunpack.c.l.s8.bf16 %v888_v18  ;;  %v929_v16 = vld [vmem:[#allocation3 + $0x358] sm:$0xff] }
 0x420   :  { %1222 = vmatprep.subr.bf16.mxu0 %v1015_v26  ;;  %1304 = vmatprep.subr.bf16.mxu1 %v1017_v27  ;;  %v1087_v26 = vunpack.c.h.s8.bf16 %v887_v11  ;;  %v1089_v27 = vunpack.c.h.s8.bf16 %v889_v12  ;;  %v920_v11 = vld [vmem:[#allocation3 + $0x310] sm:$0xff] }
 0x423   :  { %1223 = vmatpush1.bf16.msra.mxu0 %v1014_v29  ;;  %1305 = vmatpush1.bf16.msra.mxu1 %v1016_v32  ;;  %v2806_v29 = vpack.c.bf16 %v2794_v30, %v2794_v30  ;;  %v1088_v32 = vunpack.c.h.s8.bf16 %v888_v18  ;;  %v1094_v30 = vunpack.c.l.s8.bf16 %v894_v34  ;;  %v937_v34 = vld [vmem:[#allocation3 + $0x398] sm:$0xff] }
 0x424   :  { %1224 = vmatprep.subr.bf16.mxu0 %v1023_v33  ;;  %1306 = vmatprep.subr.bf16.mxu1 %v1025_v21  ;;  %v1095_v33 = vunpack.c.l.s8.bf16 %v895_v9  ;;  %v1097_v21 = vunpack.c.l.s8.bf16 %v897_v10 }
 0x427   :  { %1225 = vmatpush1.bf16.msra.mxu0 %v1022_v36  ;;  %1307 = vmatpush1.bf16.msra.mxu1 %v1024_v37  ;;  %v1096_v36 = vunpack.c.l.s8.bf16 %v896_v35  ;;  %v1103_v37 = vunpack.c.h.s8.bf16 %v895_v9  ;;  %v928_v9 = vld [vmem:[#allocation3 + $0x350] sm:$0xff] }
 0x428   :  { %1226 = vmatprep.subr.bf16.mxu0 %v1031_v38  ;;  %1308 = vmatprep.subr.bf16.mxu1 %v1033_v39  ;;  %v1105_v38 = vunpack.c.h.s8.bf16 %v897_v10  ;;  %v903_v39 = vld [vmem:[#allocation3 + $0x288] sm:$0xff] }
 0x42b   :  { %1227 = vmatpush1.bf16.msra.mxu0 %v1030_v43  ;;  %1309 = vmatpush1.bf16.msra.mxu1 %v1032_v44  ;;  %v1104_v43 = vunpack.c.h.s8.bf16 %v896_v35  ;;  %v1111_v44 = vunpack.c.l.s8.bf16 %v903_v39 }
 0x42c   :  { %1228 = vmatprep.subr.bf16.mxu0 %v1039_v45  ;;  %1310 = vmatprep.subr.bf16.mxu1 %v1041_v46  ;;  %v1113_v45 = vunpack.c.l.s8.bf16 %v905_v40  ;;  %v902_v46 = vld [vmem:[#allocation3 + $0x280] sm:$0xff] }
 0x42d   :  { %v1110_v48 = vunpack.c.l.s8.bf16 %v902_v46  ;;  %v1118_v54 = vunpack.c.h.s8.bf16 %v902_v46  ;;  %v945_v46 = vld [vmem:[#allocation3 + $0x3d8] sm:$0xff] }
 0x42f   :  { %1229 = vmatpush1.bf16.msra.mxu0 %v1038_v49  ;;  %1311 = vmatpush1.bf16.msra.mxu1 %v1040_v50  ;;  %v1112_v49 = vunpack.c.l.s8.bf16 %v904_v47  ;;  %v1119_v50 = vunpack.c.h.s8.bf16 %v903_v39  ;;  %v936_v39 = vld [vmem:[#allocation3 + $0x390] sm:$0xff] }
 0x430   :  { %1230 = vmatprep.subr.bf16.mxu0 %v1047_v51  ;;  %1312 = vmatprep.subr.bf16.mxu1 %v1049_v52  ;;  %v1121_v51 = vunpack.c.h.s8.bf16 %v905_v40  ;;  %v911_v52 = vld [vmem:[#allocation3 + $0x2c8] sm:$0xff] }
 0x433   :  { %1231 = vmatpush1.bf16.msra.mxu0 %v1046_v55  ;;  %1313 = vmatpush1.bf16.msra.mxu1 %v1048_v56  ;;  %v1120_v55 = vunpack.c.h.s8.bf16 %v904_v47  ;;  %v1127_v56 = vunpack.c.l.s8.bf16 %v911_v52 }
 0x434   :  { %1232 = vmatprep.subr.bf16.mxu0 %v1055_v57  ;;  %1314 = vmatprep.subr.bf16.mxu1 %v1057_v58  ;;  %v1129_v57 = vunpack.c.l.s8.bf16 %v913_v53  ;;  %v910_v58 = vld [vmem:[#allocation3 + $0x2c0] sm:$0xff] }
 0x435   :  { %v1126_v60 = vunpack.c.l.s8.bf16 %v910_v58  ;;  %v1134_v2 = vunpack.c.h.s8.bf16 %v910_v58  ;;  %v829_v58 = vld [vmem:[#allocation3 + $0x38] sm:$0xff] }
 0x437   :  { %1233 = vmatpush1.bf16.msra.mxu0 %v1054_v61  ;;  %1315 = vmatpush1.bf16.msra.mxu1 %v1056_v62  ;;  %v1128_v61 = vunpack.c.l.s8.bf16 %v912_v59  ;;  %v1135_v62 = vunpack.c.h.s8.bf16 %v911_v52  ;;  %v944_v52 = vld [vmem:[#allocation3 + $0x3d0] sm:$0xff] }
 0x438   :  { %1234 = vmatprep.subr.bf16.mxu0 %v1063_v63  ;;  %1316 = vmatprep.subr.bf16.mxu1 %v1065_v0  ;;  %v1137_v63 = vunpack.c.h.s8.bf16 %v913_v53  ;;  %v919_v0 = vld [vmem:[#allocation3 + $0x308] sm:$0xff] }
 0x43b   :  { %1235 = vmatpush1.bf16.msra.mxu0 %v1062_v3  ;;  %1317 = vmatpush1.bf16.msra.mxu1 %v1064_v4  ;;  %v1136_v3 = vunpack.c.h.s8.bf16 %v912_v59  ;;  %v1143_v4 = vunpack.c.l.s8.bf16 %v919_v0 }
 0x43c   :  { %1236 = vmatprep.subr.bf16.mxu0 %v1071_v5  ;;  %1318 = vmatprep.subr.bf16.mxu1 %v1073_v6  ;;  %v1145_v5 = vunpack.c.l.s8.bf16 %v921_v1  ;;  %v918_v6 = vld [vmem:[#allocation3 + $0x300] sm:$0xff] }
 0x43d   :  { %v1142_v12 = vunpack.c.l.s8.bf16 %v918_v6  ;;  %v1150_v18 = vunpack.c.h.s8.bf16 %v918_v6  ;;  %v835_v6 = vld [vmem:[#allocation3 + $0x68] sm:$0xff] }
 0x43f   :  { %1237 = vmatpush1.bf16.msra.mxu0 %v1070_v13  ;;  %1319 = vmatpush1.bf16.msra.mxu1 %v1072_v14  ;;  %v1144_v13 = vunpack.c.l.s8.bf16 %v920_v11  ;;  %v1151_v14 = vunpack.c.h.s8.bf16 %v919_v0  ;;  %v828_v0 = vld [vmem:[#allocation3 + $0x30] sm:$0xff] }
 0x440   :  { %1247 = vmatprep.subr.bf16.mxu0 %v1079_v7  ;;  %1329 = vmatprep.subr.bf16.mxu1 %v1081_v15  ;;  %v1153_v7 = vunpack.c.h.s8.bf16 %v921_v1  ;;  %v927_v15 = vld [vmem:[#allocation3 + $0x348] sm:$0xff]  ;;  %v2814_v1 = vpack.c.bf16 %v2792_v28, %v2792_v28  ;;  %v971_v28 = vunpack.c.l.s8.bf16 %v835_v6 }
 0x442   :  { %1239 = vmatmul.mubr.bf16.vlgmr.msra.gmra.mrb[12].mxu0 %v2802_v20  ;;  %1321 = vmatmul.mubr.bf16.vlgmr.msra.gmra.mrb[8].mxu1 %v2802_v20 }
 0x443   :  { %1248 = vmatpush1.bf16.msra.mxu0 %v1078_v8  ;;  %1330 = vmatpush1.bf16.msra.mxu1 %v1080_v22  ;;  %v1152_v8 = vunpack.c.h.s8.bf16 %v920_v11  ;;  %v1159_v22 = vunpack.c.l.s8.bf16 %v927_v15  ;;  %v837_v11 = vld [vmem:[#allocation3 + $0x78] sm:$0xff] }
 0x444   :  { %1249 = vmatprep.subr.bf16.mxu0 %v1087_v26  ;;  %1331 = vmatprep.subr.bf16.mxu1 %v1089_v27  ;;  %v1161_v26 = vunpack.c.l.s8.bf16 %v929_v16  ;;  %v926_v27 = vld [vmem:[#allocation3 + $0x340] sm:$0xff] }
 0x445   :  { %1279 = vmatprep.mubr.bf16.mxu0 %v2806_v29  ;;  %1361 = vmatprep.mubr.bf16.mxu1 %v2806_v29  ;;  %v1158_v10 = vunpack.c.l.s8.bf16 %v926_v27  ;;  %v1166_v35 = vunpack.c.h.s8.bf16 %v926_v27  ;;  %v845_v27 = vld [vmem:[#allocation3 + $0xb8] sm:$0xff] }
 0x447   :  { %1250 = vmatpush1.bf16.msra.mxu0 %v1086_v41  ;;  %1332 = vmatpush1.bf16.msra.mxu1 %v1088_v32  ;;  %v1160_v41 = vunpack.c.l.s8.bf16 %v928_v9  ;;  %v1167_v32 = vunpack.c.h.s8.bf16 %v927_v15  ;;  %v836_v15 = vld [vmem:[#allocation3 + $0x70] sm:$0xff] }
 0x448   :  { %1251 = vmatprep.subr.bf16.mxu0 %v1095_v33  ;;  %1333 = vmatprep.subr.bf16.mxu1 %v1097_v21  ;;  %v1169_v33 = vunpack.c.h.s8.bf16 %v929_v16  ;;  %v935_v21 = vld [vmem:[#allocation3 + $0x388] sm:$0xff] }
 0x44b   :  { %1252 = vmatpush1.bf16.msra.mxu0 %v1094_v30  ;;  %1334 = vmatpush1.bf16.msra.mxu1 %v1096_v36  ;;  %v1168_v30 = vunpack.c.h.s8.bf16 %v928_v9  ;;  %v1175_v36 = vunpack.c.l.s8.bf16 %v935_v21 }
 0x44c   :  { %1253 = vmatprep.subr.bf16.mxu0 %v1103_v37  ;;  %1335 = vmatprep.subr.bf16.mxu1 %v1105_v38  ;;  %v1177_v37 = vunpack.c.l.s8.bf16 %v937_v34  ;;  %v934_v38 = vld [vmem:[#allocation3 + $0x380] sm:$0xff] }
 0x44d   :  { %v1174_v40 = vunpack.c.l.s8.bf16 %v934_v38  ;;  %v1182_v47 = vunpack.c.h.s8.bf16 %v934_v38 }
 0x44f   :  { %1254 = vmatpush1.bf16.msra.mxu0 %v1102_v42  ;;  %1336 = vmatpush1.bf16.msra.mxu1 %v1104_v43  ;;  %v1176_v42 = vunpack.c.l.s8.bf16 %v936_v39  ;;  %v1183_v43 = vunpack.c.h.s8.bf16 %v935_v21 }
 0x450   :  { %1255 = vmatprep.subr.bf16.mxu0 %v1111_v44  ;;  %1337 = vmatprep.subr.bf16.mxu1 %v1113_v45  ;;  %v1185_v44 = vunpack.c.h.s8.bf16 %v937_v34  ;;  %v943_v45 = vld [vmem:[#allocation3 + $0x3c8] sm:$0xff] }
 0x453   :  { %1256 = vmatpush1.bf16.msra.mxu0 %v1110_v48  ;;  %1338 = vmatpush1.bf16.msra.mxu1 %v1112_v49  ;;  %v1184_v48 = vunpack.c.h.s8.bf16 %v936_v39  ;;  %v1191_v49 = vunpack.c.l.s8.bf16 %v943_v45 }
 0x454   :  { %1257 = vmatprep.subr.bf16.mxu0 %v1119_v50  ;;  %1339 = vmatprep.subr.bf16.mxu1 %v1121_v51  ;;  %v1193_v50 = vunpack.c.l.s8.bf16 %v945_v46  ;;  %v942_v51 = vld [vmem:[#allocation3 + $0x3c0] sm:$0xff] }
 0x455   :  { %v1190_v53 = vunpack.c.l.s8.bf16 %v942_v51  ;;  %v1198_v59 = vunpack.c.h.s8.bf16 %v942_v51 }
 0x457   :  { %1258 = vmatpush1.bf16.msra.mxu0 %v1118_v54  ;;  %1340 = vmatpush1.bf16.msra.mxu1 %v1120_v55  ;;  %v1192_v54 = vunpack.c.l.s8.bf16 %v944_v52  ;;  %v1199_v55 = vunpack.c.h.s8.bf16 %v943_v45 }
 0x458   :  { %1259 = vmatprep.subr.bf16.mxu0 %v1127_v56  ;;  %1341 = vmatprep.subr.bf16.mxu1 %v1129_v57  ;;  %v1201_v56 = vunpack.c.h.s8.bf16 %v945_v46  ;;  %v827_v57 = vld [vmem:[#allocation3 + $0x28] sm:$0xff] }
 0x45b   :  { %1260 = vmatpush1.bf16.msra.mxu0 %v1126_v60  ;;  %1342 = vmatpush1.bf16.msra.mxu1 %v1128_v61  ;;  %v1200_v60 = vunpack.c.h.s8.bf16 %v944_v52  ;;  %v955_v61 = vunpack.c.l.s8.bf16 %v827_v57 }
 0x45c   :  { %1261 = vmatprep.subr.bf16.mxu0 %v1135_v62  ;;  %1343 = vmatprep.subr.bf16.mxu1 %v1137_v63  ;;  %v957_v62 = vunpack.c.l.s8.bf16 %v829_v58  ;;  %v826_v63 = vld [vmem:[#allocation3 + $0x20] sm:$0xff] }
 0x45f   :  { %1262 = vmatpush1.bf16.msra.mxu0 %v1134_v2  ;;  %1344 = vmatpush1.bf16.msra.mxu1 %v1136_v3  ;;  %v954_v2 = vunpack.c.l.s8.bf16 %v826_v63  ;;  %v956_v3 = vunpack.c.l.s8.bf16 %v828_v0 }
 0x460   :  { %1263 = vmatprep.subr.bf16.mxu0 %v1143_v4  ;;  %1345 = vmatprep.subr.bf16.mxu1 %v1145_v5  ;;  %v963_v4 = vunpack.c.h.s8.bf16 %v827_v57  ;;  %v965_v5 = vunpack.c.h.s8.bf16 %v829_v58 }
 0x463   :  { %1264 = vmatpush1.bf16.msra.mxu0 %v1142_v12  ;;  %1346 = vmatpush1.bf16.msra.mxu1 %v1144_v13  ;;  %v962_v12 = vunpack.c.h.s8.bf16 %v826_v63  ;;  %v964_v13 = vunpack.c.h.s8.bf16 %v828_v0 }
 0x464   :  { %1265 = vmatprep.subr.bf16.mxu0 %v1151_v14  ;;  %1347 = vmatprep.subr.bf16.mxu1 %v1153_v7  ;;  %v973_v14 = vunpack.c.l.s8.bf16 %v837_v11  ;;  %v834_v7 = vld [vmem:[#allocation3 + $0x60] sm:$0xff] }
 0x465   :  { %v970_v16 = vunpack.c.l.s8.bf16 %v834_v7  ;;  %v978_v9 = vunpack.c.h.s8.bf16 %v834_v7 }
 0x467   :  { %1266 = vmatpush1.bf16.msra.mxu0 %v1150_v18  ;;  %1348 = vmatpush1.bf16.msra.mxu1 %v1152_v8  ;;  %v972_v18 = vunpack.c.l.s8.bf16 %v836_v15  ;;  %v979_v8 = vunpack.c.h.s8.bf16 %v835_v6 }
 0x468   :  { %1267 = vmatprep.subr.bf16.mxu0 %v1159_v22  ;;  %1349 = vmatprep.subr.bf16.mxu1 %v1161_v26  ;;  %v981_v22 = vunpack.c.h.s8.bf16 %v837_v11  ;;  %v843_v26 = vld [vmem:[#allocation3 + $0xa8] sm:$0xff] }
 0x46b   :  { %1268 = vmatpush1.bf16.msra.mxu0 %v1158_v10  ;;  %1350 = vmatpush1.bf16.msra.mxu1 %v1160_v41  ;;  %v980_v10 = vunpack.c.h.s8.bf16 %v836_v15  ;;  %v987_v41 = vunpack.c.l.s8.bf16 %v843_v26 }
 0x46c   :  { %1269 = vmatprep.subr.bf16.mxu0 %v1167_v32  ;;  %1351 = vmatprep.subr.bf16.mxu1 %v1169_v33  ;;  %v989_v32 = vunpack.c.l.s8.bf16 %v845_v27  ;;  %v842_v33 = vld [vmem:[#allocation3 + $0xa0] sm:$0xff] }
 0x46d   :  { %v986_v21 = vunpack.c.l.s8.bf16 %v842_v33  ;;  %v994_v38 = vunpack.c.h.s8.bf16 %v842_v33 }
 0x46f   :  { %1270 = vmatpush1.bf16.msra.mxu0 %v1166_v35  ;;  %1352 = vmatpush1.bf16.msra.mxu1 %v1168_v30  ;;  %v995_v35 = vunpack.c.h.s8.bf16 %v843_v26  ;;  %v997_v30 = vunpack.c.h.s8.bf16 %v845_v27 }
 0x470   :  { %1271 = vmatprep.subr.bf16.mxu0 %v1175_v36  ;;  %1353 = vmatprep.subr.bf16.mxu1 %v1177_v37  ;;  %v851_v36 = vld [vmem:[#allocation3 + $0xe8] sm:$0xff]  ;;  %v853_v37 = vld [vmem:[#allocation3 + $0xf8] sm:$0xff] }
 0x473   :  { %1272 = vmatpush1.bf16.msra.mxu0 %v1174_v40  ;;  %1354 = vmatpush1.bf16.msra.mxu1 %v1176_v42  ;;  %v1003_v40 = vunpack.c.l.s8.bf16 %v851_v36  ;;  %v1005_v42 = vunpack.c.l.s8.bf16 %v853_v37 }
 0x474   :  { %1273 = vmatprep.subr.bf16.mxu0 %v1183_v43  ;;  %1355 = vmatprep.subr.bf16.mxu1 %v1185_v44  ;;  %v850_v43 = vld [vmem:[#allocation3 + $0xe0] sm:$0xff]  ;;  %v852_v44 = vld [vmem:[#allocation3 + $0xf0] sm:$0xff] }
 0x475   :  { %v1002_v45 = vunpack.c.l.s8.bf16 %v850_v43  ;;  %v1004_v46 = vunpack.c.l.s8.bf16 %v852_v44  ;;  %v1010_v51 = vunpack.c.h.s8.bf16 %v850_v43  ;;  %v1012_v52 = vunpack.c.h.s8.bf16 %v852_v44 }
 0x477   :  { %1274 = vmatpush1.bf16.msra.mxu0 %v1182_v47  ;;  %1356 = vmatpush1.bf16.msra.mxu1 %v1184_v48  ;;  %v1011_v47 = vunpack.c.h.s8.bf16 %v851_v36  ;;  %v1013_v48 = vunpack.c.h.s8.bf16 %v853_v37 }
 0x478   :  { %1275 = vmatprep.subr.bf16.mxu0 %v1191_v49  ;;  %1357 = vmatprep.subr.bf16.mxu1 %v1193_v50  ;;  %v859_v49 = vld [vmem:[#allocation3 + $0x128] sm:$0xff]  ;;  %v861_v50 = vld [vmem:[#allocation3 + $0x138] sm:$0xff] }
 0x47b   :  { %1276 = vmatpush1.bf16.msra.mxu0 %v1190_v53  ;;  %1358 = vmatpush1.bf16.msra.mxu1 %v1192_v54  ;;  %v1019_v53 = vunpack.c.l.s8.bf16 %v859_v49  ;;  %v1021_v54 = vunpack.c.l.s8.bf16 %v861_v50 }
 0x47c   :  { %1277 = vmatprep.subr.bf16.mxu0 %v1199_v55  ;;  %1359 = vmatprep.subr.bf16.mxu1 %v1201_v56  ;;  %v858_v55 = vld [vmem:[#allocation3 + $0x120] sm:$0xff]  ;;  %v860_v56 = vld [vmem:[#allocation3 + $0x130] sm:$0xff] }
 0x47d   :  { %v1018_v57 = vunpack.c.l.s8.bf16 %v858_v55  ;;  %v1020_v58 = vunpack.c.l.s8.bf16 %v860_v56  ;;  %v1026_v63 = vunpack.c.h.s8.bf16 %v858_v55  ;;  %v1028_v0 = vunpack.c.h.s8.bf16 %v860_v56 }
 0x47f   :  { %1278 = vmatpush1.bf16.msra.mxu0 %v1198_v59  ;;  %1360 = vmatpush1.bf16.msra.mxu1 %v1200_v60  ;;  %v1027_v59 = vunpack.c.h.s8.bf16 %v859_v49  ;;  %v1029_v60 = vunpack.c.h.s8.bf16 %v861_v50 }
 0x480   :  { %1370 = vmatprep.subr.bf16.mxu0 %v955_v61  ;;  %1452 = vmatprep.subr.bf16.mxu1 %v957_v62  ;;  %v867_v61 = vld [vmem:[#allocation3 + $0x168] sm:$0xff]  ;;  %v869_v62 = vld [vmem:[#allocation3 + $0x178] sm:$0xff] }
 0x482   :  { %1280 = vmatmul.mubr.bf16.vlgmr.msra.gmra.mrb[12].mxu0 %v2814_v1  ;;  %1362 = vmatmul.mubr.bf16.vlgmr.msra.gmra.mrb[8].mxu1 %v2814_v1 }
 0x483   :  { %1371 = vmatpush1.bf16.msra.mxu0 %v954_v2  ;;  %1453 = vmatpush1.bf16.msra.mxu1 %v956_v3  ;;  %v1035_v2 = vunpack.c.l.s8.bf16 %v867_v61  ;;  %v1037_v3 = vunpack.c.l.s8.bf16 %v869_v62 }
 0x484   :  { %1372 = vmatprep.subr.bf16.mxu0 %v963_v4  ;;  %1454 = vmatprep.subr.bf16.mxu1 %v965_v5  ;;  %v866_v4 = vld [vmem:[#allocation3 + $0x160] sm:$0xff]  ;;  %v868_v5 = vld [vmem:[#allocation3 + $0x170] sm:$0xff] }
 0x485   :  { %1402 = vmatprep.mubr.bf16.mxu0 %v2796_v31  ;;  %1484 = vmatprep.mubr.bf16.mxu1 %v2796_v31  ;;  %v844_v31 = vld [vmem:[#allocation3 + $0xb0] sm:$0xff]  ;;  %v1034_v6 = vunpack.c.l.s8.bf16 %v866_v4  ;;  %v1036_v11 = vunpack.c.l.s8.bf16 %v868_v5  ;;  %v1042_v7 = vunpack.c.h.s8.bf16 %v866_v4  ;;  %v1044_v15 = vunpack.c.h.s8.bf16 %v868_v5 }
 0x486   :  { %v988_v34 = vunpack.c.l.s8.bf16 %v844_v31  ;;  %v996_v39 = vunpack.c.h.s8.bf16 %v844_v31 }
 0x487   :  { %1373 = vmatpush1.bf16.msra.mxu0 %v962_v12  ;;  %1455 = vmatpush1.bf16.msra.mxu1 %v964_v13  ;;  %v1043_v12 = vunpack.c.h.s8.bf16 %v867_v61  ;;  %v1045_v13 = vunpack.c.h.s8.bf16 %v869_v62 }
 0x488   :  { %1374 = vmatprep.subr.bf16.mxu0 %v971_v28  ;;  %1456 = vmatprep.subr.bf16.mxu1 %v973_v14  ;;  %v875_v28 = vld [vmem:[#allocation3 + $0x1a8] sm:$0xff]  ;;  %v877_v14 = vld [vmem:[#allocation3 + $0x1b8] sm:$0xff] }
 0x48b   :  { %1375 = vmatpush1.bf16.msra.mxu0 %v970_v16  ;;  %1457 = vmatpush1.bf16.msra.mxu1 %v972_v18  ;;  %v1051_v16 = vunpack.c.l.s8.bf16 %v875_v28  ;;  %v1053_v18 = vunpack.c.l.s8.bf16 %v877_v14 }
 0x48c   :  { %1376 = vmatprep.subr.bf16.mxu0 %v979_v8  ;;  %1458 = vmatprep.subr.bf16.mxu1 %v981_v22  ;;  %v874_v8 = vld [vmem:[#allocation3 + $0x1a0] sm:$0xff]  ;;  %v876_v22 = vld [vmem:[#allocation3 + $0x1b0] sm:$0xff] }
 0x48d   :  { %v1050_v26 = vunpack.c.l.s8.bf16 %v874_v8  ;;  %v1052_v27 = vunpack.c.l.s8.bf16 %v876_v22  ;;  %v1058_v33 = vunpack.c.h.s8.bf16 %v874_v8  ;;  %v1060_v31 = vunpack.c.h.s8.bf16 %v876_v22 }
 0x48f   :  { %1377 = vmatpush1.bf16.msra.mxu0 %v978_v9  ;;  %1459 = vmatpush1.bf16.msra.mxu1 %v980_v10  ;;  %v1059_v9 = vunpack.c.h.s8.bf16 %v875_v28  ;;  %v1061_v10 = vunpack.c.h.s8.bf16 %v877_v14 }
 0x490   :  { %1378 = vmatprep.subr.bf16.mxu0 %v987_v41  ;;  %1460 = vmatprep.subr.bf16.mxu1 %v989_v32  ;;  %v883_v41 = vld [vmem:[#allocation3 + $0x1e8] sm:$0xff]  ;;  %v885_v32 = vld [vmem:[#allocation3 + $0x1f8] sm:$0xff] }
 0x493   :  { %1379 = vmatpush1.bf16.msra.mxu0 %v986_v21  ;;  %1461 = vmatpush1.bf16.msra.mxu1 %v988_v34  ;;  %v1067_v21 = vunpack.c.l.s8.bf16 %v883_v41  ;;  %v1069_v34 = vunpack.c.l.s8.bf16 %v885_v32 }
 0x494   :  { %1380 = vmatprep.subr.bf16.mxu0 %v995_v35  ;;  %1462 = vmatprep.subr.bf16.mxu1 %v997_v30  ;;  %v882_v35 = vld [vmem:[#allocation3 + $0x1e0] sm:$0xff]  ;;  %v884_v30 = vld [vmem:[#allocation3 + $0x1f0] sm:$0xff] }
 0x495   :  { %v1066_v36 = vunpack.c.l.s8.bf16 %v882_v35  ;;  %v1068_v37 = vunpack.c.l.s8.bf16 %v884_v30  ;;  %v1074_v43 = vunpack.c.h.s8.bf16 %v882_v35  ;;  %v1076_v44 = vunpack.c.h.s8.bf16 %v884_v30 }
 0x497   :  { %1381 = vmatpush1.bf16.msra.mxu0 %v994_v38  ;;  %1463 = vmatpush1.bf16.msra.mxu1 %v996_v39  ;;  %v1075_v38 = vunpack.c.h.s8.bf16 %v883_v41  ;;  %v1077_v39 = vunpack.c.h.s8.bf16 %v885_v32 }
 0x498   :  { %1382 = vmatprep.subr.bf16.mxu0 %v1003_v40  ;;  %1464 = vmatprep.subr.bf16.mxu1 %v1005_v42  ;;  %v891_v40 = vld [vmem:[#allocation3 + $0x228] sm:$0xff]  ;;  %v893_v42 = vld [vmem:[#allocation3 + $0x238] sm:$0xff] }
 0x49b   :  { %1383 = vmatpush1.bf16.msra.mxu0 %v1002_v45  ;;  %1465 = vmatpush1.bf16.msra.mxu1 %v1004_v46  ;;  %v1083_v45 = vunpack.c.l.s8.bf16 %v891_v40  ;;  %v1085_v46 = vunpack.c.l.s8.bf16 %v893_v42 }
 0x49c   :  { %1384 = vmatprep.subr.bf16.mxu0 %v1011_v47  ;;  %1466 = vmatprep.subr.bf16.mxu1 %v1013_v48  ;;  %v890_v47 = vld [vmem:[#allocation3 + $0x220] sm:$0xff]  ;;  %v892_v48 = vld [vmem:[#allocation3 + $0x230] sm:$0xff] }
 0x49d   :  { %v1082_v49 = vunpack.c.l.s8.bf16 %v890_v47  ;;  %v1084_v50 = vunpack.c.l.s8.bf16 %v892_v48  ;;  %v1090_v55 = vunpack.c.h.s8.bf16 %v890_v47  ;;  %v1092_v56 = vunpack.c.h.s8.bf16 %v892_v48 }
 0x49f   :  { %1385 = vmatpush1.bf16.msra.mxu0 %v1010_v51  ;;  %1467 = vmatpush1.bf16.msra.mxu1 %v1012_v52  ;;  %v1091_v51 = vunpack.c.h.s8.bf16 %v891_v40  ;;  %v1093_v52 = vunpack.c.h.s8.bf16 %v893_v42 }
 0x4a0   :  { %1386 = vmatprep.subr.bf16.mxu0 %v1019_v53  ;;  %1468 = vmatprep.subr.bf16.mxu1 %v1021_v54  ;;  %v899_v53 = vld [vmem:[#allocation3 + $0x268] sm:$0xff]  ;;  %v901_v54 = vld [vmem:[#allocation3 + $0x278] sm:$0xff] }
 0x4a3   :  { %1387 = vmatpush1.bf16.msra.mxu0 %v1018_v57  ;;  %1469 = vmatpush1.bf16.msra.mxu1 %v1020_v58  ;;  %v1099_v57 = vunpack.c.l.s8.bf16 %v899_v53  ;;  %v1101_v58 = vunpack.c.l.s8.bf16 %v901_v54 }
 0x4a4   :  { %1388 = vmatprep.subr.bf16.mxu0 %v1027_v59  ;;  %1470 = vmatprep.subr.bf16.mxu1 %v1029_v60  ;;  %v898_v59 = vld [vmem:[#allocation3 + $0x260] sm:$0xff]  ;;  %v900_v60 = vld [vmem:[#allocation3 + $0x270] sm:$0xff] }
 0x4a5   :  { %v1098_v61 = vunpack.c.l.s8.bf16 %v898_v59  ;;  %v1100_v62 = vunpack.c.l.s8.bf16 %v900_v60  ;;  %v1108_v4 = vunpack.c.h.s8.bf16 %v900_v60 }
 0x4a7   :  { %1389 = vmatpush1.bf16.msra.mxu0 %v1026_v63  ;;  %1471 = vmatpush1.bf16.msra.mxu1 %v1028_v0  ;;  %v1109_v63 = vunpack.c.h.s8.bf16 %v901_v54  ;;  %v907_v0 = vld [vmem:[#allocation3 + $0x2a8] sm:$0xff] }
 0x4a8   :  { %1390 = vmatprep.subr.bf16.mxu0 %v1035_v2  ;;  %1472 = vmatprep.subr.bf16.mxu1 %v1037_v3  ;;  %v909_v2 = vld [vmem:[#allocation3 + $0x2b8] sm:$0xff]  ;;  %v1106_v3 = vunpack.c.h.s8.bf16 %v898_v59  ;;  %v1115_v5 = vunpack.c.l.s8.bf16 %v907_v0  ;;  %v1123_v28 = vunpack.c.h.s8.bf16 %v907_v0 }
 0x4a9   :  { %v1125_v14 = vunpack.c.h.s8.bf16 %v909_v2 }
 0x4ab   :  { %1391 = vmatpush1.bf16.msra.mxu0 %v1034_v6  ;;  %1473 = vmatpush1.bf16.msra.mxu1 %v1036_v11  ;;  %v1117_v6 = vunpack.c.l.s8.bf16 %v909_v2  ;;  %v906_v11 = vld [vmem:[#allocation3 + $0x2a0] sm:$0xff] }
 0x4ac   :  { %1392 = vmatprep.subr.bf16.mxu0 %v1043_v12  ;;  %1474 = vmatprep.subr.bf16.mxu1 %v1045_v13  ;;  %v1114_v12 = vunpack.c.l.s8.bf16 %v906_v11 }
 0x4af   :  { %1393 = vmatpush1.bf16.msra.mxu0 %v1042_v7  ;;  %1475 = vmatpush1.bf16.msra.mxu1 %v1044_v15  ;;  %v915_v7 = vld [vmem:[#allocation3 + $0x2e8] sm:$0xff]  ;;  %v917_v15 = vld [vmem:[#allocation3 + $0x2f8] sm:$0xff] }
 0x4b0   :  { %1394 = vmatprep.subr.bf16.mxu0 %v1051_v16  ;;  %1476 = vmatprep.subr.bf16.mxu1 %v1053_v18  ;;  %v1122_v16 = vunpack.c.h.s8.bf16 %v906_v11  ;;  %v1131_v8 = vunpack.c.l.s8.bf16 %v915_v7  ;;  %v1133_v22 = vunpack.c.l.s8.bf16 %v917_v15  ;;  %v1139_v41 = vunpack.c.h.s8.bf16 %v915_v7 }
 0x4b1   :  { %v1141_v32 = vunpack.c.h.s8.bf16 %v917_v15 }
 0x4b3   :  { %1395 = vmatpush1.bf16.msra.mxu0 %v1050_v26  ;;  %1477 = vmatpush1.bf16.msra.mxu1 %v1052_v27  ;;  %v914_v26 = vld [vmem:[#allocation3 + $0x2e0] sm:$0xff]  ;;  %v916_v27 = vld [vmem:[#allocation3 + $0x2f0] sm:$0xff] }
 0x4b4   :  { %1396 = vmatprep.subr.bf16.mxu0 %v1059_v9  ;;  %1478 = vmatprep.subr.bf16.mxu1 %v1061_v10  ;;  %v1130_v9 = vunpack.c.l.s8.bf16 %v914_v26  ;;  %v1132_v10 = vunpack.c.l.s8.bf16 %v916_v27 }
 0x4b7   :  { %1397 = vmatpush1.bf16.msra.mxu0 %v1058_v33  ;;  %1479 = vmatpush1.bf16.msra.mxu1 %v1060_v31  ;;  %v923_v33 = vld [vmem:[#allocation3 + $0x328] sm:$0xff]  ;;  %v925_v31 = vld [vmem:[#allocation3 + $0x338] sm:$0xff] }
 0x4b8   :  { %1398 = vmatprep.subr.bf16.mxu0 %v1067_v21  ;;  %1480 = vmatprep.subr.bf16.mxu1 %v1069_v34  ;;  %v1138_v21 = vunpack.c.h.s8.bf16 %v914_v26  ;;  %v1140_v34 = vunpack.c.h.s8.bf16 %v916_v27  ;;  %v1147_v35 = vunpack.c.l.s8.bf16 %v923_v33  ;;  %v1149_v30 = vunpack.c.l.s8.bf16 %v925_v31 }
 0x4b9   :  { %v1155_v40 = vunpack.c.h.s8.bf16 %v923_v33  ;;  %v1157_v42 = vunpack.c.h.s8.bf16 %v925_v31 }
 0x4bb   :  { %1399 = vmatpush1.bf16.msra.mxu0 %v1066_v36  ;;  %1481 = vmatpush1.bf16.msra.mxu1 %v1068_v37  ;;  %v922_v36 = vld [vmem:[#allocation3 + $0x320] sm:$0xff]  ;;  %v924_v37 = vld [vmem:[#allocation3 + $0x330] sm:$0xff] }
 0x4bc   :  { %1400 = vmatprep.subr.bf16.mxu0 %v1075_v38  ;;  %1482 = vmatprep.subr.bf16.mxu1 %v1077_v39  ;;  %v1146_v38 = vunpack.c.l.s8.bf16 %v922_v36  ;;  %v1148_v39 = vunpack.c.l.s8.bf16 %v924_v37 }
 0x4bf   :  { %1401 = vmatpush1.bf16.msra.mxu0 %v1074_v43  ;;  %1483 = vmatpush1.bf16.msra.mxu1 %v1076_v44  ;;  %v931_v43 = vld [vmem:[#allocation3 + $0x368] sm:$0xff]  ;;  %v933_v44 = vld [vmem:[#allocation3 + $0x378] sm:$0xff] }
 0x4c0   :  { %1411 = vmatprep.subr.bf16.mxu0 %v1083_v45  ;;  %1493 = vmatprep.subr.bf16.mxu1 %v1085_v46  ;;  %v1154_v45 = vunpack.c.h.s8.bf16 %v922_v36  ;;  %v1156_v46 = vunpack.c.h.s8.bf16 %v924_v37  ;;  %v1163_v47 = vunpack.c.l.s8.bf16 %v931_v43  ;;  %v1165_v48 = vunpack.c.l.s8.bf16 %v933_v44 }
 0x4c1   :  { %v1173_v54 = vunpack.c.h.s8.bf16 %v933_v44 }
 0x4c2   :  { %1403 = vmatmul.mubr.bf16.vlgmr.msra.gmra.mrb[16].mxu0 %v2802_v20  ;;  %1485 = vmatmul.mubr.bf16.vlgmr.msra.gmra.mrb[12].mxu1 %v2802_v20  ;;  %v1107_v20 = vunpack.c.h.s8.bf16 %v899_v53  ;;  %v1171_v53 = vunpack.c.h.s8.bf16 %v931_v43 }
 0x4c3   :  { %1412 = vmatpush1.bf16.msra.mxu0 %v1082_v49  ;;  %1494 = vmatpush1.bf16.msra.mxu1 %v1084_v50  ;;  %v930_v49 = vld [vmem:[#allocation3 + $0x360] sm:$0xff]  ;;  %v932_v50 = vld [vmem:[#allocation3 + $0x370] sm:$0xff] }
 0x4c4   :  { %1413 = vmatprep.subr.bf16.mxu0 %v1091_v51  ;;  %1495 = vmatprep.subr.bf16.mxu1 %v1093_v52  ;;  %v1162_v51 = vunpack.c.l.s8.bf16 %v930_v49  ;;  %v1164_v52 = vunpack.c.l.s8.bf16 %v932_v50 }
 0x4c5   :  { %1443 = vmatprep.mubr.bf16.mxu0 %v2806_v29  ;;  %1525 = vmatprep.mubr.bf16.mxu1 %v2806_v29  ;;  %v908_v29 = vld [vmem:[#allocation3 + $0x2b0] sm:$0xff] }
 0x4c6   :  { %v1116_v13 = vunpack.c.l.s8.bf16 %v908_v29  ;;  %v1124_v18 = vunpack.c.h.s8.bf16 %v908_v29 }
 0x4c7   :  { %1414 = vmatpush1.bf16.msra.mxu0 %v1090_v55  ;;  %1496 = vmatpush1.bf16.msra.mxu1 %v1092_v56  ;;  %v939_v55 = vld [vmem:[#allocation3 + $0x3a8] sm:$0xff]  ;;  %v941_v56 = vld [vmem:[#allocation3 + $0x3b8] sm:$0xff] }
 0x4c8   :  { %1415 = vmatprep.subr.bf16.mxu0 %v1099_v57  ;;  %1497 = vmatprep.subr.bf16.mxu1 %v1101_v58  ;;  %v1170_v57 = vunpack.c.h.s8.bf16 %v930_v49  ;;  %v1172_v58 = vunpack.c.h.s8.bf16 %v932_v50  ;;  %v1179_v59 = vunpack.c.l.s8.bf16 %v939_v55  ;;  %v1181_v60 = vunpack.c.l.s8.bf16 %v941_v56 }
 0x4c9   :  { %v1187_v0 = vunpack.c.h.s8.bf16 %v939_v55  ;;  %v1189_v2 = vunpack.c.h.s8.bf16 %v941_v56 }
 0x4cb   :  { %1416 = vmatpush1.bf16.msra.mxu0 %v1098_v61  ;;  %1498 = vmatpush1.bf16.msra.mxu1 %v1100_v62  ;;  %v938_v61 = vld [vmem:[#allocation3 + $0x3a0] sm:$0xff]  ;;  %v940_v62 = vld [vmem:[#allocation3 + $0x3b0] sm:$0xff] }
 0x4cc   :  { %1417 = vmatprep.subr.bf16.mxu0 %v1107_v20  ;;  %1499 = vmatprep.subr.bf16.mxu1 %v1109_v63  ;;  %v1178_v20 = vunpack.c.l.s8.bf16 %v938_v61  ;;  %v1180_v63 = vunpack.c.l.s8.bf16 %v940_v62 }
 0x4cf   :  { %1418 = vmatpush1.bf16.msra.mxu0 %v1106_v3  ;;  %1500 = vmatpush1.bf16.msra.mxu1 %v1108_v4  ;;  %v947_v3 = vld [vmem:[#allocation3 + $0x3e8] sm:$0xff]  ;;  %v949_v4 = vld [vmem:[#allocation3 + $0x3f8] sm:$0xff] }
 0x4d0   :  { %1419 = vmatprep.subr.bf16.mxu0 %v1115_v5  ;;  %1501 = vmatprep.subr.bf16.mxu1 %v1117_v6  ;;  %v1186_v5 = vunpack.c.h.s8.bf16 %v938_v61  ;;  %v1188_v6 = vunpack.c.h.s8.bf16 %v940_v62  ;;  %v1195_v11 = vunpack.c.l.s8.bf16 %v947_v3  ;;  %v1197_v29 = vunpack.c.l.s8.bf16 %v949_v4 }
 0x4d1   :  { %v1203_v7 = vunpack.c.h.s8.bf16 %v947_v3  ;;  %v1205_v15 = vunpack.c.h.s8.bf16 %v949_v4 }
 0x4d3   :  { %1420 = vmatpush1.bf16.msra.mxu0 %v1114_v12  ;;  %1502 = vmatpush1.bf16.msra.mxu1 %v1116_v13  ;;  %v946_v12 = vld [vmem:[#allocation3 + $0x3e0] sm:$0xff]  ;;  %v948_v13 = vld [vmem:[#allocation3 + $0x3f0] sm:$0xff] }
 0x4d4   :  { %1421 = vmatprep.subr.bf16.mxu0 %v1123_v28  ;;  %1503 = vmatprep.subr.bf16.mxu1 %v1125_v14  ;;  %v1194_v28 = vunpack.c.l.s8.bf16 %v946_v12  ;;  %v1196_v14 = vunpack.c.l.s8.bf16 %v948_v13 }
 0x4d7   :  { %1422 = vmatpush1.bf16.msra.mxu0 %v1122_v16  ;;  %1504 = vmatpush1.bf16.msra.mxu1 %v1124_v18  ;;  %v1202_v16 = vunpack.c.h.s8.bf16 %v946_v12  ;;  %v1204_v18 = vunpack.c.h.s8.bf16 %v948_v13 }
 0x4d8   :  { %1423 = vmatprep.subr.bf16.mxu0 %v1131_v8  ;;  %1505 = vmatprep.subr.bf16.mxu1 %v1133_v22  ;;  %v2826_v8 = vld [vmem:[#allocation6 + $0x21] sm:$0xff] }
 0x4d9   :  { %v1539_v22 = vrot.slane %v2826_v8, %v2746_v24  ;;  %v1547_v26 = vrot.slane %v2826_v8, %v2760_v17  ;;  %v1543_v27 = vrot.slane %v2826_v8, %v2749_v25 }
 0x4db   :  { %1424 = vmatpush1.bf16.msra.mxu0 %v1130_v9  ;;  %1506 = vmatpush1.bf16.msra.mxu1 %v1132_v10  ;;  %v1551_v9 = vrot.slane %v2826_v8, %v2763_v19 }
 0x4dc   :  { %1425 = vmatprep.subr.bf16.mxu0 %v1139_v41  ;;  %1507 = vmatprep.subr.bf16.mxu1 %v1141_v32 }
 0x4df   :  { %1426 = vmatpush1.bf16.msra.mxu0 %v1138_v21  ;;  %1508 = vmatpush1.bf16.msra.mxu1 %v1140_v34 }
 0x4e0   :  { %1427 = vmatprep.subr.bf16.mxu0 %v1147_v35  ;;  %1509 = vmatprep.subr.bf16.mxu1 %v1149_v30 }
 0x4e3   :  { %1428 = vmatpush1.bf16.msra.mxu0 %v1146_v38  ;;  %1510 = vmatpush1.bf16.msra.mxu1 %v1148_v39 }
 0x4e4   :  { %1429 = vmatprep.subr.bf16.mxu0 %v1155_v40  ;;  %1511 = vmatprep.subr.bf16.mxu1 %v1157_v42 }
 0x4e7   :  { %1430 = vmatpush1.bf16.msra.mxu0 %v1154_v45  ;;  %1512 = vmatpush1.bf16.msra.mxu1 %v1156_v46 }
 0x4e8   :  { %1431 = vmatprep.subr.bf16.mxu0 %v1163_v47  ;;  %1513 = vmatprep.subr.bf16.mxu1 %v1165_v48 }
 0x4eb   :  { %1432 = vmatpush1.bf16.msra.mxu0 %v1162_v51  ;;  %1514 = vmatpush1.bf16.msra.mxu1 %v1164_v52 }
 0x4ec   :  { %1433 = vmatprep.subr.bf16.mxu0 %v1171_v53  ;;  %1515 = vmatprep.subr.bf16.mxu1 %v1173_v54 }
 0x4ef   :  { %1434 = vmatpush1.bf16.msra.mxu0 %v1170_v57  ;;  %1516 = vmatpush1.bf16.msra.mxu1 %v1172_v58 }
 0x4f0   :  { %1435 = vmatprep.subr.bf16.mxu0 %v1179_v59  ;;  %1517 = vmatprep.subr.bf16.mxu1 %v1181_v60 }
 0x4f3   :  { %1436 = vmatpush1.bf16.msra.mxu0 %v1178_v20  ;;  %1518 = vmatpush1.bf16.msra.mxu1 %v1180_v63 }
 0x4f4   :  { %1437 = vmatprep.subr.bf16.mxu0 %v1187_v0  ;;  %1519 = vmatprep.subr.bf16.mxu1 %v1189_v2 }
 0x4f7   :  { %1438 = vmatpush1.bf16.msra.mxu0 %v1186_v5  ;;  %1520 = vmatpush1.bf16.msra.mxu1 %v1188_v6 }
 0x4f8   :  { %1439 = vmatprep.subr.bf16.mxu0 %v1195_v11  ;;  %1521 = vmatprep.subr.bf16.mxu1 %v1197_v29 }
 0x4fb   :  { %1440 = vmatpush1.bf16.msra.mxu0 %v1194_v28  ;;  %1522 = vmatpush1.bf16.msra.mxu1 %v1196_v14 }
 0x4fc   :  { %1441 = vmatprep.subr.bf16.mxu0 %v1203_v7  ;;  %1523 = vmatprep.subr.bf16.mxu1 %v1205_v15 }
 0x4ff   :  { %1442 = vmatpush1.bf16.msra.mxu0 %v1202_v16  ;;  %1524 = vmatpush1.bf16.msra.mxu1 %v1204_v18 }
 0x502   :  { %1444 = vmatmul.mubr.bf16.vlgmr.msra.gmra.mrb[16].mxu0 %v2814_v1  ;;  %1526 = vmatmul.mubr.bf16.vlgmr.msra.gmra.mrb[12].mxu1 %v2814_v1 }
 0x555   :  { %v1281_v10 = vpop.f32.mrb[12].mxu0  ;;  %v1363_v41 = vpop.f32.mrb[8].mxu1 }
 0x556   :  { %v1576_v32 = vmul.f32 %v1539_v22, %v1281_v10  ;;  %v1578_v33 = vmul.f32 %v1547_v26, %v1363_v41  ;;  %v1283_v31 = vpop.f32.mrb[13].mxu0  ;;  %v1365_v1 = vpop.f32.mrb[9].mxu1 }
 0x557   :  { %v1577_v21 = vmul.f32 %v1543_v27, %v1283_v31  ;;  %v1579_v34 = vmul.f32 %v1551_v9, %v1365_v1  ;;  %v1285_v35 = vpop.f32.mrb[14].mxu0  ;;  %v1367_v30 = vpop.f32.mrb[10].mxu1 }
 0x558   :  { %v1586_v36 = vsel %vm380_vm6, %v1576_v32, 0.0  ;;  %v1600_v37 = vsel %vm380_vm6, %v1578_v33, 0.0  ;;  %v1286_v38 = vpop.f32.mrb[15].mxu0  ;;  %v1368_v39 = vpop.f32.mrb[11].mxu1 }
 0x559   :  { %v1587_v40 = vrot.slane %v1586_v36, 4  ;;  %v1601_v42 = vrot.slane %v1600_v37, 4  ;;  %v1593_v43 = vsel %vm380_vm6, %v1577_v21, 0.0  ;;  %v1607_v44 = vsel %vm380_vm6, %v1579_v34, 0.0 }
 0x55a   :  { %v1594_v45 = vrot.slane %v1593_v43, 4  ;;  %v1608_v46 = vrot.slane %v1607_v44, 4 }
 0x55b   :  { %v1588_v47 = vadd.f32 %v1587_v40, %v1586_v36  ;;  %v1602_v48 = vadd.f32 %v1601_v42, %v1600_v37 }
 0x55c   :  { %v1595_v49 = vadd.f32 %v1594_v45, %v1593_v43  ;;  %v1609_v50 = vadd.f32 %v1608_v46, %v1607_v44 }
 0x55d   :  { %v1589_v51 = vrot.slane %v1588_v47, 2  ;;  %v1603_v52 = vrot.slane %v1602_v48, 2 }
 0x55e   :  { %v1596_v53 = vrot.slane %v1595_v49, 2  ;;  %v1610_v54 = vrot.slane %v1609_v50, 2 }
 0x55f   :  { %v1590_v55 = vadd.f32 %v1589_v51, %v1588_v47  ;;  %v1604_v56 = vadd.f32 %v1603_v52, %v1602_v48 }
 0x560   :  { %v1597_v57 = vadd.f32 %v1596_v53, %v1595_v49  ;;  %v1611_v58 = vadd.f32 %v1610_v54, %v1609_v50 }
 0x561   :  { %v1591_v59 = vrot.slane %v1590_v55, 1  ;;  %v1605_v60 = vrot.slane %v1604_v56, 1 }
 0x562   :  { %v1598_v61 = vrot.slane %v1597_v57, 1  ;;  %v1612_v62 = vrot.slane %v1611_v58, 1 }
 0x563   :  { %v1592_v20 = vadd.f32 %v1591_v59, %v1590_v55  ;;  %v1606_v63 = vadd.f32 %v1605_v60, %v1604_v56 }
 0x564   :  { %v1599_v0 = vadd.f32 %v1598_v61, %v1597_v57  ;;  %v1613_v2 = vadd.f32 %v1612_v62, %v1611_v58  ;;  %v2848_v57 = vld [vmem:[#allocation6 + $0x11] sm:$0xff]  ;;  %v2850_v58 = vld [vmem:[#allocation6 + $0x19] sm:$0xff] }
 0x565   :  { %v1642_v3 = vmul.f32 0.25, %v1592_v20  ;;  %v1644_v4 = vmul.f32 0.25, %v1606_v63  ;;  %v1758_v59 = vrot.slane %v2848_v57, %v2746_v24  ;;  %v1766_v61 = vrot.slane %v2848_v57, %v2760_v17 }
 0x566   :  { %v1643_v5 = vmul.f32 0.25, %v1599_v0  ;;  %v1645_v6 = vmul.f32 0.25, %v1613_v2  ;;  %v1807_v63 = vrot.slane %v2850_v58, %v2746_v24  ;;  %v1762_v0 = vrot.slane %v2848_v57, %v2749_v25 }
 0x567   :  { %v1650_v11 = vsub.f32 %v1576_v32, %v1642_v3  ;;  %v1652_v29 = vsub.f32 %v1578_v33, %v1644_v4  ;;  %v1815_v4 = vrot.slane %v2850_v58, %v2760_v17 }
 0x568   :  { %v1651_v12 = vsub.f32 %v1577_v21, %v1643_v5  ;;  %v2840_v13 = vsub.f32 %v1579_v34, %v1645_v6  ;;  %v1770_v5 = vrot.slane %v2848_v57, %v2763_v19 }
 0x569   :  { %v1658_v28 = vmul.f32 %v1650_v11, %v1650_v11  ;;  %v1660_v14 = vmul.f32 %v1652_v29, %v1652_v29 }
 0x56a   :  { %v1659_v7 = vmul.f32 %v1651_v12, %v1651_v12  ;;  %v1661_v15 = vmul.f32 %v2840_v13, %v2840_v13 }
 0x56b   :  { %v1666_v16 = vsel %vm380_vm6, %v1658_v28, 0.0  ;;  %v1680_v18 = vsel %vm380_vm6, %v1660_v14, 0.0 }
 0x56c   :  { %v1667_v22 = vrot.slane %v1666_v16, 4  ;;  %v1681_v26 = vrot.slane %v1680_v18, 4  ;;  %v1673_v27 = vsel %vm380_vm6, %v1659_v7, 0.0  ;;  %v1687_v9 = vsel %vm380_vm6, %v1661_v15, 0.0 }
 0x56d   :  { %v1674_v10 = vrot.slane %v1673_v27, 4  ;;  %v1688_v41 = vrot.slane %v1687_v9, 4  ;;  %v1819_v15 = vrot.slane %v2850_v58, %v2763_v19 }
 0x56e   :  { %v1668_v32 = vadd.f32 %v1667_v22, %v1666_v16  ;;  %v1682_v33 = vadd.f32 %v1681_v26, %v1680_v18 }
 0x56f   :  { %v1675_v31 = vadd.f32 %v1674_v10, %v1673_v27  ;;  %v1689_v1 = vadd.f32 %v1688_v41, %v1687_v9 }
 0x570   :  { %v1669_v21 = vrot.slane %v1668_v32, 2  ;;  %v1683_v34 = vrot.slane %v1682_v33, 2 }
 0x571   :  { %v1676_v35 = vrot.slane %v1675_v31, 2  ;;  %v1690_v30 = vrot.slane %v1689_v1, 2 }
 0x572   :  { %v1670_v36 = vadd.f32 %v1669_v21, %v1668_v32  ;;  %v1684_v37 = vadd.f32 %v1683_v34, %v1682_v33  ;;  %v2878_v32 = vsub.s32 4, %v2743_v23  ;;  %v2881_v33 = vsub.s32 6, %v2743_v23 }
 0x573   :  { %v1677_v38 = vadd.f32 %v1676_v35, %v1675_v31  ;;  %v1691_v39 = vadd.f32 %v1690_v30, %v1689_v1  ;;  %v2884_v31 = vsub.s32 5, %v2743_v23  ;;  %v2887_v1 = vsub.s32 7, %v2743_v23 }
 0x574   :  { %v1671_v40 = vrot.slane %v1670_v36, 1  ;;  %v1685_v42 = vrot.slane %v1684_v37, 1  ;;  %v1555_v21 = vrot.slane %v2826_v8, %v2878_v32  ;;  %v1563_v34 = vrot.slane %v2826_v8, %v2881_v33 }
 0x575   :  { %v1678_v43 = vrot.slane %v1677_v38, 1  ;;  %v1692_v44 = vrot.slane %v1691_v39, 1  ;;  %v1559_v35 = vrot.slane %v2826_v8, %v2884_v31  ;;  %v1567_v30 = vrot.slane %v2826_v8, %v2887_v1 }
 0x576   :  { %v1672_v45 = vadd.f32 %v1671_v40, %v1670_v36  ;;  %v1686_v46 = vadd.f32 %v1685_v42, %v1684_v37 }
 0x577   :  { %v1679_v47 = vadd.f32 %v1678_v43, %v1677_v38  ;;  %v1693_v48 = vadd.f32 %v1692_v44, %v1691_v39 }
 0x578   :  { %v1722_v49 = vmul.f32 0.25, %v1672_v45  ;;  %v1724_v50 = vmul.f32 0.25, %v1686_v46 }
 0x579   :  { %v1723_v51 = vmul.f32 0.25, %v1679_v47  ;;  %v1725_v52 = vmul.f32 0.25, %v1693_v48 }
 0x57a   :  { %v1730_v53 = vadd.f32 0.8, %v1722_v49  ;;  %v1732_v54 = vadd.f32 0.8, %v1724_v50 }
 0x57b   :  { %v1731_v55 = vadd.f32 0.8, %v1723_v51  ;;  %v1733_v56 = vadd.f32 0.8, %v1725_v52 }
 0x57c   :  { %2403 = vrsqrt.f32 %v1730_v53 }
 0x57d   :  { %2405 = vrsqrt.f32 %v1732_v54 }
 0x57e   :  { %2407 = vrsqrt.f32 %v1731_v55 }
 0x57f   :  { %2409 = vrsqrt.f32 %v1733_v56 }
 0x586   :  { %v2404_v60 = vpop.eup %2403 }
 0x587   :  { %v2406_v62 = vpop.eup %2405  ;;  %v1746_v20 = vmul.f32 %v2404_v60, %v1650_v11  ;;  %v1811_v11 = vrot.slane %v2850_v58, %v2749_v25 }
 0x588   :  { %v2408_v2 = vpop.eup %2407  ;;  %v1748_v3 = vmul.f32 %v2406_v62, %v1652_v29 }
 0x589   :  { %v2410_v6 = vpop.eup %2409  ;;  %v1795_v28 = vmul.f32 %v1758_v59, %v1746_v20  ;;  %v1747_v14 = vmul.f32 %v2408_v2, %v1651_v12 }
 0x58a   :  { %v1797_v7 = vmul.f32 %v1766_v61, %v1748_v3  ;;  %v1749_v24 = vmul.f32 %v2410_v6, %v2840_v13 }
 0x58b   :  { %v1844_v16 = vadd.f32 %v1807_v63, %v1795_v28  ;;  %v1796_v29 = vmul.f32 %v1762_v0, %v1747_v14 }
 0x58c   :  { %v1846_v18 = vadd.f32 %v1815_v4, %v1797_v7  ;;  %v1798_v22 = vmul.f32 %v1770_v5, %v1749_v24 }
 0x58d   :  { %vm1852_vm13 = vcmp.ge.f32.partialorder %v1844_v16, 0.0  ;;  %v1860_v17 = vmul.f32 0.2, %v1844_v16  ;;  %v1845_v26 = vadd.f32 %v1811_v11, %v1796_v29 }
 0x58e   :  { %vm1854_vm14 = vcmp.ge.f32.partialorder %v1846_v18, 0.0  ;;  %v1862_v27 = vmul.f32 0.2, %v1846_v18  ;;  %v1847_v9 = vadd.f32 %v1819_v15, %v1798_v22 }
 0x58f   :  { %v2869_v12 = vsel %vm1852_vm13, %v1844_v16, %v1860_v17  ;;  %vm1853_vm15 = vcmp.ge.f32.partialorder %v1845_v26, 0.0  ;;  %v1861_v25 = vmul.f32 0.2, %v1845_v26 }
 0x590   :  { %v2871_v10 = vsel %vm1854_vm14, %v1846_v18, %v1862_v27  ;;  %vm1855_vm0 = vcmp.ge.f32.partialorder %v1847_v9, 0.0  ;;  %v1863_v13 = vmul.f32 0.2, %v1847_v9 }
 0x591   :  { %v2873_v41 = vsel %vm1853_vm15, %v1845_v26, %v1861_v25 }
 0x592   :  { %v2875_v19 = vsel %vm1855_vm0, %v1847_v9, %v1863_v13 }
 0x5d5   :  { %v1445_v36 = vpop.f32.mrb[16].mxu0  ;;  %v1527_v37 = vpop.f32.mrb[12].mxu1 }
 0x5d6   :  { %v1580_v38 = vmul.f32 %v1555_v21, %v1445_v36  ;;  %v1582_v39 = vmul.f32 %v1563_v34, %v1527_v37  ;;  %v1447_v40 = vpop.f32.mrb[17].mxu0  ;;  %v1529_v42 = vpop.f32.mrb[13].mxu1 }
 0x5d7   :  { %v1581_v23 = vmul.f32 %v1559_v35, %v1447_v40  ;;  %v1583_v43 = vmul.f32 %v1567_v30, %v1529_v42  ;;  %v1449_v44 = vpop.f32.mrb[18].mxu0  ;;  %v1531_v45 = vpop.f32.mrb[14].mxu1 }
 0x5d8   :  { %v1614_v46 = vsel %vm380_vm6, %v1580_v38, 0.0  ;;  %v1628_v47 = vsel %vm380_vm6, %v1582_v39, 0.0  ;;  %v1450_v48 = vpop.f32.mrb[19].mxu0  ;;  %v1532_v49 = vpop.f32.mrb[15].mxu1 }
 0x5d9   :  { %v1615_v50 = vrot.slane %v1614_v46, 4  ;;  %v1629_v51 = vrot.slane %v1628_v47, 4  ;;  %v1621_v8 = vsel %vm380_vm6, %v1581_v23, 0.0  ;;  %v1635_v52 = vsel %vm380_vm6, %v1583_v43, 0.0 }
 0x5da   :  { %v1622_v53 = vrot.slane %v1621_v8, 4  ;;  %v1636_v54 = vrot.slane %v1635_v52, 4 }
 0x5db   :  { %v1616_v55 = vadd.f32 %v1615_v50, %v1614_v46  ;;  %v1630_v56 = vadd.f32 %v1629_v51, %v1628_v47 }
 0x5dc   :  { %v1623_v59 = vadd.f32 %v1622_v53, %v1621_v8  ;;  %v1637_v60 = vadd.f32 %v1636_v54, %v1635_v52 }
 0x5dd   :  { %v1617_v61 = vrot.slane %v1616_v55, 2  ;;  %v1631_v62 = vrot.slane %v1630_v56, 2 }
 0x5de   :  { %v1624_v20 = vrot.slane %v1623_v59, 2  ;;  %v1638_v63 = vrot.slane %v1637_v60, 2 }
 0x5df   :  { %v1618_v0 = vadd.f32 %v1617_v61, %v1616_v55  ;;  %v1632_v2 = vadd.f32 %v1631_v62, %v1630_v56 }
 0x5e0   :  { %v1625_v3 = vadd.f32 %v1624_v20, %v1623_v59  ;;  %v1639_v4 = vadd.f32 %v1638_v63, %v1637_v60 }
 0x5e1   :  { %v1619_v5 = vrot.slane %v1618_v0, 1  ;;  %v1633_v6 = vrot.slane %v1632_v2, 1 }
 0x5e2   :  { %v1626_v28 = vrot.slane %v1625_v3, 1  ;;  %v1640_v14 = vrot.slane %v1639_v4, 1 }
 0x5e3   :  { %v1620_v11 = vadd.f32 %v1619_v5, %v1618_v0  ;;  %v1634_v7 = vadd.f32 %v1633_v6, %v1632_v2 }
 0x5e4   :  { %v1627_v24 = vadd.f32 %v1626_v28, %v1625_v3  ;;  %v1641_v15 = vadd.f32 %v1640_v14, %v1639_v4  ;;  %v1774_v28 = vrot.slane %v2848_v57, %v2878_v32 }
 0x5e5   :  { %v1646_v16 = vmul.f32 0.25, %v1620_v11  ;;  %v1648_v29 = vmul.f32 0.25, %v1634_v7  ;;  %v1782_v11 = vrot.slane %v2848_v57, %v2881_v33 }
 0x5e6   :  { %v1647_v18 = vmul.f32 0.25, %v1627_v24  ;;  %v1649_v22 = vmul.f32 0.25, %v1641_v15  ;;  %v1823_v15 = vrot.slane %v2850_v58, %v2878_v32  ;;  %v1835_v32 = vrot.slane %v2850_v58, %v2887_v1 }
 0x5e7   :  { %v1654_v17 = vsub.f32 %v1580_v38, %v1646_v16  ;;  %v1656_v26 = vsub.f32 %v1582_v39, %v1648_v29  ;;  %v1778_v16 = vrot.slane %v2848_v57, %v2884_v31 }
 0x5e8   :  { %v1655_v27 = vsub.f32 %v1581_v23, %v1647_v18  ;;  %v1657_v9 = vsub.f32 %v1583_v43, %v1649_v22  ;;  %v1831_v22 = vrot.slane %v2850_v58, %v2881_v33 }
 0x5e9   :  { %v1662_v25 = vmul.f32 %v1654_v17, %v1654_v17  ;;  %v1664_v13 = vmul.f32 %v1656_v26, %v1656_v26 }
 0x5ea   :  { %v1663_v21 = vmul.f32 %v1655_v27, %v1655_v27  ;;  %v1665_v34 = vmul.f32 %v1657_v9, %v1657_v9 }
 0x5eb   :  { %v1694_v35 = vsel %vm380_vm6, %v1662_v25, 0.0  ;;  %v1708_v30 = vsel %vm380_vm6, %v1664_v13, 0.0  ;;  %v1786_v25 = vrot.slane %v2848_v57, %v2887_v1 }
 0x5ec   :  { %v1695_v36 = vrot.slane %v1694_v35, 4  ;;  %v1709_v37 = vrot.slane %v1708_v30, 4  ;;  %v1701_v40 = vsel %vm380_vm6, %v1663_v21, 0.0  ;;  %v1715_v42 = vsel %vm380_vm6, %v1665_v34, 0.0 }
 0x5ed   :  { %v1702_v44 = vrot.slane %v1701_v40, 4  ;;  %v1716_v45 = vrot.slane %v1715_v42, 4 }
 0x5ee   :  { %v1696_v38 = vadd.f32 %v1695_v36, %v1694_v35  ;;  %v1710_v39 = vadd.f32 %v1709_v37, %v1708_v30 }
 0x5ef   :  { %v1703_v23 = vadd.f32 %v1702_v44, %v1701_v40  ;;  %v1717_v43 = vadd.f32 %v1716_v45, %v1715_v42 }
 0x5f0   :  { %v1697_v46 = vrot.slane %v1696_v38, 2  ;;  %v1711_v47 = vrot.slane %v1710_v39, 2 }
 0x5f1   :  { %v1704_v48 = vrot.slane %v1703_v23, 2  ;;  %v1718_v49 = vrot.slane %v1717_v43, 2 }
 0x5f2   :  { %v1698_v50 = vadd.f32 %v1697_v46, %v1696_v38  ;;  %v1712_v51 = vadd.f32 %v1711_v47, %v1710_v39 }
 0x5f3   :  { %v1705_v8 = vadd.f32 %v1704_v48, %v1703_v23  ;;  %v1719_v52 = vadd.f32 %v1718_v49, %v1717_v43 }
 0x5f4   :  { %v1699_v53 = vrot.slane %v1698_v50, 1  ;;  %v1713_v54 = vrot.slane %v1712_v51, 1 }
 0x5f5   :  { %v1706_v55 = vrot.slane %v1705_v8, 1  ;;  %v1720_v56 = vrot.slane %v1719_v52, 1 }
 0x5f6   :  { %v1700_v59 = vadd.f32 %v1699_v53, %v1698_v50  ;;  %v1714_v60 = vadd.f32 %v1713_v54, %v1712_v51 }
 0x5f7   :  { %v1707_v61 = vadd.f32 %v1706_v55, %v1705_v8  ;;  %v1721_v62 = vadd.f32 %v1720_v56, %v1719_v52 }
 0x5f8   :  { %v1726_v20 = vmul.f32 0.25, %v1700_v59  ;;  %v1728_v63 = vmul.f32 0.25, %v1714_v60 }
 0x5f9   :  { %v1727_v0 = vmul.f32 0.25, %v1707_v61  ;;  %v1729_v2 = vmul.f32 0.25, %v1721_v62 }
 0x5fa   :  { %v1734_v3 = vadd.f32 0.8, %v1726_v20  ;;  %v1736_v4 = vadd.f32 0.8, %v1728_v63 }
 0x5fb   :  { %v1735_v5 = vadd.f32 0.8, %v1727_v0  ;;  %v1737_v6 = vadd.f32 0.8, %v1729_v2 }
 0x5fc   :  { %2411 = vrsqrt.f32 %v1734_v3 }
 0x5fd   :  { %2413 = vrsqrt.f32 %v1736_v4 }
 0x5fe   :  { %2415 = vrsqrt.f32 %v1735_v5 }
 0x5ff   :  { %2417 = vrsqrt.f32 %v1737_v6 }
 0x606   :  { %v2412_v14 = vpop.eup %2411 }
 0x607   :  { %v2414_v7 = vpop.eup %2413  ;;  %v1750_v24 = vmul.f32 %v2412_v14, %v1654_v17  ;;  %v1827_v17 = vrot.slane %v2850_v58, %v2884_v31 }
 0x608   :  { %v2416_v29 = vpop.eup %2415  ;;  %v1752_v18 = vmul.f32 %v2414_v7, %v1656_v26 }
 0x609   :  { %v2418_v13 = vpop.eup %2417  ;;  %v1799_v21 = vmul.f32 %v1774_v28, %v1750_v24  ;;  %v1751_v34 = vmul.f32 %v2416_v29, %v1655_v27 }
 0x60a   :  { %v1801_v35 = vmul.f32 %v1782_v11, %v1752_v18  ;;  %v1753_v30 = vmul.f32 %v2418_v13, %v1657_v9 }
 0x60b   :  { %v1848_v36 = vadd.f32 %v1823_v15, %v1799_v21  ;;  %v1800_v37 = vmul.f32 %v1778_v16, %v1751_v34 }
 0x60c   :  { %v1850_v26 = vadd.f32 %v1831_v22, %v1801_v35  ;;  %v1802_v40 = vmul.f32 %v1786_v25, %v1753_v30 }
 0x60d   :  { %vm1856_vm1 = vcmp.ge.f32.partialorder %v1848_v36, 0.0  ;;  %v1864_v33 = vmul.f32 0.2, %v1848_v36  ;;  %v1849_v42 = vadd.f32 %v1827_v17, %v1800_v37 }
 0x60e   :  { %vm1858_vm2 = vcmp.ge.f32.partialorder %v1850_v26, 0.0  ;;  %v1866_v57 = vmul.f32 0.2, %v1850_v26  ;;  %v1851_v44 = vadd.f32 %v1835_v32, %v1802_v40 }
 0x60f   :  { %v2921_v45 = vsel %vm1856_vm1, %v1848_v36, %v1864_v33  ;;  %vm1857_vm3 = vcmp.ge.f32.partialorder %v1849_v42, 0.0  ;;  %v1865_v27 = vmul.f32 0.2, %v1849_v42 }
 0x610   :  { %v2923_v31 = vsel %vm1858_vm2, %v1850_v26, %v1866_v57  ;;  %vm1859_vm4 = vcmp.ge.f32.partialorder %v1851_v44, 0.0  ;;  %v1867_v9 = vmul.f32 0.2, %v1851_v44 }
 0x611   :  { %v2925_v38 = vsel %vm1857_vm3, %v1849_v42, %v1865_v27 }
 0x612   :  { %v2927_v58 = vsel %vm1859_vm4, %v1851_v44, %v1867_v9 }
 0x613   :  { %2583 = dma.done.wait [#allocation5 + $0x2], 4096 }
 0x614   :  { %2584 = vsyncadd [#allocation5 + $0x2], 4294963200  ;;  %v1881_v1 = vpack.c.bf16 %v2873_v41, %v2873_v41  ;;  %v1883_v39 = vpack.c.bf16 %v2875_v19, %v2875_v19  ;;  %v1892_v23 = vld [vmem:[#allocation4 + $0x20] sm:$0xff]  ;;  %v1893_v53 = vld [vmem:[#allocation4 + $0x28] sm:$0xff]  ;;  %v1880_v27 = vpack.c.bf16 %v2869_v12, %v2869_v12  ;;  %v1882_v9 = vpack.c.bf16 %v2871_v10, %v2871_v10  ;;  %s2600_s8 = smov [#allocation12]  }
 0x615   :  { %v1900_v43 = vld [vmem:[#allocation4 + $0x60] sm:$0xff]  ;;  %v1928_v47 = vunpack.c.l.s8.bf16 %v1892_v23  ;;  %v1929_v48 = vunpack.c.h.s8.bf16 %v1892_v23  ;;  %v1901_v54 = vld [vmem:[#allocation4 + $0x68] sm:$0xff]  ;;  %v1930_v19 = vunpack.c.l.s8.bf16 %v1893_v53  ;;  %v1931_v20 = vunpack.c.h.s8.bf16 %v1893_v53  ;;  %v1894_v0 = vld [vmem:[#allocation4 + $0x30] sm:$0xff]  ;;  %s2168_s16 = sshll.u32 %s2600_s8, 4  ;;  %s2169_s16 = int_to_ptr.vmem [resolvable:$true] %s2168_s16 }
 0x616   :  { %2016 = vmatprep.mubr.bf16.mxu0 %v1881_v1  ;;  %2056 = vmatprep.mubr.bf16.mxu1 %v1883_v39  ;;  %v1888_v46 = vld [vmem:[#allocation4] sm:$0xff]  ;;  %v1944_v49 = vunpack.c.l.s8.bf16 %v1900_v43  ;;  %v1945_v50 = vunpack.c.h.s8.bf16 %v1900_v43  ;;  %v1946_v56 = vunpack.c.l.s8.bf16 %v1901_v54  ;;  %v1889_v59 = vld [vmem:[#allocation4 + $0x8] sm:$0xff]  ;;  %v1947_v63 = vunpack.c.h.s8.bf16 %v1901_v54  ;;  %v1902_v2 = vld [vmem:[#allocation4 + $0x70] sm:$0xff]  ;;  %s2553_s17 = scalar_lea.vmem %s2169_s16, 64  ;;  %p2558_p7 = scmp.lt.s32.totalorder %s2169_s16, %s2169_s16 }
 0x617   :  { %v1896_v51 = vld [vmem:[#allocation4 + $0x40] sm:$0xff]  ;;  %v1920_v8 = vunpack.c.l.s8.bf16 %v1888_v46  ;;  %2231 = vmatprep.subr.bf16.mxu0 %v1928_v47  ;;  %v1921_v41 = vunpack.c.h.s8.bf16 %v1888_v46  ;;  %v1897_v60 = vld [vmem:[#allocation4 + $0x48] sm:$0xff]  ;;  %v1922_v61 = vunpack.c.l.s8.bf16 %v1889_v59  ;;  %v1923_v3 = vunpack.c.h.s8.bf16 %v1889_v59  ;;  %v1890_v28 = vld [vmem:[#allocation4 + $0x10] sm:$0xff]  ;;  %p2554_p6 = scmp.ne.s32.totalorder %s2169_s16, %s2553_s17  ;;  %p2559_p8 = scmp.lt.s32.totalorder %s2553_s17, %s2553_s17 }
 0x618   :  { %v1936_v52 = vunpack.c.l.s8.bf16 %v1896_v51  ;;  %2253 = vmatprep.subr.bf16.mxu1 %v1944_v49  ;;  %v1937_v55 = vunpack.c.h.s8.bf16 %v1896_v51  ;;  %v1938_v62 = vunpack.c.l.s8.bf16 %v1897_v60  ;;  %v1939_v4 = vunpack.c.h.s8.bf16 %v1897_v60  ;;  %v1898_v14 = vld [vmem:[#allocation4 + $0x50] sm:$0xff]  ;;  %v1895_v16 = vld [vmem:[#allocation4 + $0x38] sm:$0xff]  ;;  %v1908_v36 = vld [vmem:[#allocation4 + $0xa0] sm:$0xff] }
 0x619   :  { %2232 = vmatpush3.bf16.msra.mxu0 %v1920_v8  ;;  %v1932_v5 = vunpack.c.l.s8.bf16 %v1894_v0  ;;  %v1948_v6 = vunpack.c.l.s8.bf16 %v1902_v2  ;;  %v1924_v11 = vunpack.c.l.s8.bf16 %v1890_v28  ;;  %v1940_v7 = vunpack.c.l.s8.bf16 %v1898_v14  ;;  %v1903_v29 = vld [vmem:[#allocation4 + $0x78] sm:$0xff]  ;;  %v1916_v37 = vld [vmem:[#allocation4 + $0xe0] sm:$0xff]  ;;  %v1909_v46 = vld [vmem:[#allocation4 + $0xa8] sm:$0xff]  ;;  %p2560_p9 = por %p2559_p8, %p2558_p7 }
 0x61a   :  { %2254 = vmatpush3.bf16.msra.mxu1 %v1936_v52  ;;  %2233 = vmatprep.subr.bf16.mxu0 %v1929_v48  ;;  %v1933_v24 = vunpack.c.h.s8.bf16 %v1894_v0  ;;  %v1949_v15 = vunpack.c.h.s8.bf16 %v1902_v2  ;;  %v1925_v18 = vunpack.c.h.s8.bf16 %v1890_v28  ;;  %v1941_v22 = vunpack.c.h.s8.bf16 %v1898_v14  ;;  %v1891_v21 = vld [vmem:[#allocation4 + $0x18] sm:$0xff]  ;;  %v1904_v57 = vld [vmem:[#allocation4 + $0x80] sm:$0xff]  ;;  %v1917_v47 = vld [vmem:[#allocation4 + $0xe8] sm:$0xff] }
 0x61b   :  { %2255 = vmatprep.subr.bf16.mxu1 %v1945_v50  ;;  %v1934_v25 = vunpack.c.l.s8.bf16 %v1895_v16  ;;  %v1950_v13 = vunpack.c.l.s8.bf16 %v1903_v29  ;;  %v1899_v34 = vld [vmem:[#allocation4 + $0x58] sm:$0xff]  ;;  %v1926_v17 = vunpack.c.l.s8.bf16 %v1891_v21  ;;  %v1935_v30 = vunpack.c.h.s8.bf16 %v1895_v16  ;;  %v1912_v44 = vld [vmem:[#allocation4 + $0xc0] sm:$0xff]  ;;  %v1905_v8 = vld [vmem:[#allocation4 + $0x88] sm:$0xff]  ;;  %p2561_p10 = pnand %p2560_p9, %p2554_p6 }
 0x61c   :  { %v1942_v35 = vunpack.c.l.s8.bf16 %v1899_v34  ;;  %v1951_v32 = vunpack.c.h.s8.bf16 %v1903_v29  ;;  %v1927_v26 = vunpack.c.h.s8.bf16 %v1891_v21  ;;  %v1943_v40 = vunpack.c.h.s8.bf16 %v1899_v34  ;;  %v1913_v52 = vld [vmem:[#allocation4 + $0xc8] sm:$0xff] }
 0x61d   :  { %2234 = vmatpush3.bf16.msra.mxu0 %v1921_v41  ;;  %v1960_v33 = vunpack.c.l.s8.bf16 %v1908_v36  ;;  %v1976_v42 = vunpack.c.l.s8.bf16 %v1916_v37  ;;  %v1952_v1 = vunpack.c.l.s8.bf16 %v1904_v57  ;;  %v1968_v39 = vunpack.c.l.s8.bf16 %v1912_v44  ;;  %v1910_v41 = vld [vmem:[#allocation4 + $0xb0] sm:$0xff] }
 0x61e   :  { %2256 = vmatpush3.bf16.msra.mxu1 %v1937_v55  ;;  %2235 = vmatprep.subr.bf16.mxu0 %v1930_v19  ;;  %v1961_v23 = vunpack.c.h.s8.bf16 %v1908_v36  ;;  %v1977_v43 = vunpack.c.h.s8.bf16 %v1916_v37  ;;  %v1885_v48 = vpack.c.bf16 %v2925_v38, %v2925_v38  ;;  %v1887_v49 = vpack.c.bf16 %v2927_v58, %v2927_v58  ;;  %v1918_v55 = vld [vmem:[#allocation4 + $0xf0] sm:$0xff] }
 0x61f   :  { %2257 = vmatprep.subr.bf16.mxu1 %v1946_v56  ;;  %v1953_v12 = vunpack.c.h.s8.bf16 %v1904_v57  ;;  %v1969_v10 = vunpack.c.h.s8.bf16 %v1912_v44  ;;  %v1962_v50 = vunpack.c.l.s8.bf16 %v1909_v46  ;;  %v1978_v51 = vunpack.c.l.s8.bf16 %v1917_v47 }
 0x620   :  { %v1954_v38 = vunpack.c.l.s8.bf16 %v1905_v8  ;;  %v1970_v53 = vunpack.c.l.s8.bf16 %v1913_v52  ;;  %v1963_v58 = vunpack.c.h.s8.bf16 %v1909_v46  ;;  %v1979_v54 = vunpack.c.h.s8.bf16 %v1917_v47  ;;  %v2221_v46 = vld [vmem:[#allocation6 + $0x2a] ss:$0 sm:$0xff] }
 0x621   :  { %2236 = vmatpush3.bf16.msra.mxu0 %v1922_v61  ;;  %v1955_v19 = vunpack.c.h.s8.bf16 %v1905_v8  ;;  %v1971_v56 = vunpack.c.h.s8.bf16 %v1913_v52  ;;  %v1964_v59 = vunpack.c.l.s8.bf16 %v1910_v41  ;;  %v1980_v60 = vunpack.c.l.s8.bf16 %v1918_v55  ;;  %v1906_v61 = vld [vmem:[#allocation4 + $0x90] sm:$0xff] }
 0x622   :  { %2258 = vmatpush3.bf16.msra.mxu1 %v1938_v62  ;;  %2237 = vmatprep.subr.bf16.mxu0 %v1931_v20  ;;  %v1914_v62 = vld [vmem:[#allocation4 + $0xd0] sm:$0xff]  ;;  %v1956_v20 = vunpack.c.l.s8.bf16 %v1906_v61  ;;  %v1965_v0 = vunpack.c.h.s8.bf16 %v1910_v41  ;;  %v1981_v2 = vunpack.c.h.s8.bf16 %v1918_v55 }
 0x623   :  { %2259 = vmatprep.subr.bf16.mxu1 %v1947_v63  ;;  %v1972_v63 = vunpack.c.l.s8.bf16 %v1914_v62 }
 0x625   :  { %2238 = vmatpush3.bf16.msra.mxu0 %v1923_v3  ;;  %v1911_v3 = vld [vmem:[#allocation4 + $0xb8] sm:$0xff] }
 0x626   :  { %2260 = vmatpush3.bf16.msra.mxu1 %v1939_v4  ;;  %2239 = vmatprep.subr.bf16.mxu0 %v1932_v5  ;;  %v1919_v4 = vld [vmem:[#allocation4 + $0xf8] sm:$0xff]  ;;  %v1957_v5 = vunpack.c.h.s8.bf16 %v1906_v61  ;;  %v1966_v28 = vunpack.c.l.s8.bf16 %v1911_v3  ;;  %v1967_v16 = vunpack.c.h.s8.bf16 %v1911_v3 }
 0x627   :  { %2261 = vmatprep.subr.bf16.mxu1 %v1948_v6  ;;  %v1973_v6 = vunpack.c.h.s8.bf16 %v1914_v62  ;;  %v1982_v14 = vunpack.c.l.s8.bf16 %v1919_v4  ;;  %v1983_v29 = vunpack.c.h.s8.bf16 %v1919_v4 }
 0x629   :  { %2240 = vmatpush3.bf16.msra.mxu0 %v1924_v11  ;;  %v1907_v11 = vld [vmem:[#allocation4 + $0x98] sm:$0xff] }
 0x62a   :  { %2262 = vmatpush3.bf16.msra.mxu1 %v1940_v7  ;;  %2241 = vmatprep.subr.bf16.mxu0 %v1933_v24  ;;  %v1915_v7 = vld [vmem:[#allocation4 + $0xd8] sm:$0xff]  ;;  %v1958_v24 = vunpack.c.l.s8.bf16 %v1907_v11 }
 0x62b   :  { %2263 = vmatprep.subr.bf16.mxu1 %v1949_v15  ;;  %v1974_v15 = vunpack.c.l.s8.bf16 %v1915_v7 }
 0x62d   :  { %2242 = vmatpush3.bf16.msra.mxu0 %v1925_v18  ;;  %v1959_v18 = vunpack.c.h.s8.bf16 %v1907_v11 }
 0x62e   :  { %2264 = vmatpush3.bf16.msra.mxu1 %v1941_v22  ;;  %2243 = vmatprep.subr.bf16.mxu0 %v1934_v25  ;;  %v1975_v22 = vunpack.c.h.s8.bf16 %v1915_v7  ;;  %v1884_v25 = vpack.c.bf16 %v2921_v45, %v2921_v45 }
 0x62f   :  { %2265 = vmatprep.subr.bf16.mxu1 %v1950_v13  ;;  %v1886_v13 = vpack.c.bf16 %v2923_v31, %v2923_v31 }
 0x631   :  { %2244 = vmatpush3.bf16.msra.mxu0 %v1926_v17 }
 0x632   :  { %2266 = vmatpush3.bf16.msra.mxu1 %v1942_v35  ;;  %2245 = vmatprep.subr.bf16.mxu0 %v1935_v30 }
 0x633   :  { %2267 = vmatprep.subr.bf16.mxu1 %v1951_v32 }
 0x635   :  { %2246 = vmatpush3.bf16.msra.mxu0 %v1927_v26 }
 0x636   :  { %2268 = vmatpush3.bf16.msra.mxu1 %v1943_v40  ;;  %2275 = vmatprep.subr.bf16.mxu0 %v1960_v33 }
 0x637   :  { %2297 = vmatprep.subr.bf16.mxu1 %v1976_v42 }
 0x638   :  { %2017 = vmatmul.mubr.bf16.vlgmr.msra.gmra.mrb[20].mxu0 %v1880_v27 }
 0x639   :  { %2057 = vmatmul.mubr.bf16.vlgmr.msra.gmra.mrb[16].mxu1 %v1882_v9  ;;  %2276 = vmatpush3.bf16.msra.mxu0 %v1952_v1 }
 0x63a   :  { %2298 = vmatpush3.bf16.msra.mxu1 %v1968_v39  ;;  %2277 = vmatprep.subr.bf16.mxu0 %v1961_v23 }
 0x63b   :  { %2299 = vmatprep.subr.bf16.mxu1 %v1977_v43  ;;  %2096 = vmatprep.mubr.bf16.mxu0 %v1885_v48  ;;  %v2222_v48 = vld [vmem:[#allocation6 + $0x29] ss:$0 sm:$0xff] }
 0x63c   :  { %2136 = vmatprep.mubr.bf16.mxu1 %v1887_v49 }
 0x63d   :  { %2278 = vmatpush3.bf16.msra.mxu0 %v1953_v12 }
 0x63e   :  { %2300 = vmatpush3.bf16.msra.mxu1 %v1969_v10  ;;  %2279 = vmatprep.subr.bf16.mxu0 %v1962_v50 }
 0x63f   :  { %2301 = vmatprep.subr.bf16.mxu1 %v1978_v51 }
 0x641   :  { %2280 = vmatpush3.bf16.msra.mxu0 %v1954_v38 }
 0x642   :  { %2302 = vmatpush3.bf16.msra.mxu1 %v1970_v53  ;;  %2281 = vmatprep.subr.bf16.mxu0 %v1963_v58 }
 0x643   :  { %2303 = vmatprep.subr.bf16.mxu1 %v1979_v54 }
 0x645   :  { %2282 = vmatpush3.bf16.msra.mxu0 %v1955_v19 }
 0x646   :  { %2304 = vmatpush3.bf16.msra.mxu1 %v1971_v56  ;;  %2283 = vmatprep.subr.bf16.mxu0 %v1964_v59 }
 0x647   :  { %2305 = vmatprep.subr.bf16.mxu1 %v1980_v60 }
 0x649   :  { %2284 = vmatpush3.bf16.msra.mxu0 %v1956_v20 }
 0x64a   :  { %2306 = vmatpush3.bf16.msra.mxu1 %v1972_v63  ;;  %2285 = vmatprep.subr.bf16.mxu0 %v1965_v0 }
 0x64b   :  { %2307 = vmatprep.subr.bf16.mxu1 %v1981_v2 }
 0x64d   :  { %2286 = vmatpush3.bf16.msra.mxu0 %v1957_v5 }
 0x64e   :  { %2308 = vmatpush3.bf16.msra.mxu1 %v1973_v6  ;;  %2287 = vmatprep.subr.bf16.mxu0 %v1966_v28 }
 0x64f   :  { %2309 = vmatprep.subr.bf16.mxu1 %v1982_v14 }
 0x651   :  { %2288 = vmatpush3.bf16.msra.mxu0 %v1958_v24 }
 0x652   :  { %2310 = vmatpush3.bf16.msra.mxu1 %v1974_v15  ;;  %2289 = vmatprep.subr.bf16.mxu0 %v1967_v16 }
 0x653   :  { %2311 = vmatprep.subr.bf16.mxu1 %v1983_v29 }
 0x655   :  { %2290 = vmatpush3.bf16.msra.mxu0 %v1959_v18 }
 0x656   :  { %2312 = vmatpush3.bf16.msra.mxu1 %v1975_v22 }
 0x658   :  { %2097 = vmatmul.mubr.bf16.vlgmr.msra.gmra.mrb[24].mxu0 %v1884_v25 }
 0x659   :  { %2137 = vmatmul.mubr.bf16.vlgmr.msra.gmra.mrb[20].mxu1 %v1886_v13 }
 0x70b   :  { %v2247_v21 = vpop.f32.mrb[20].mxu0 }
 0x70c   :  { %v2269_v34 = vpop.f32.mrb[16].mxu1  ;;  %v2248_v17 = vpop.f32.mrb[21].mxu0 }
 0x70d   :  { %v2270_v35 = vpop.f32.mrb[17].mxu1  ;;  %v2249_v30 = vadd.f32 %v2248_v17, %v2247_v21  ;;  %v2250_v36 = vpop.f32.mrb[22].mxu0 }
 0x70e   :  { %v2271_v32 = vadd.f32 %v2270_v35, %v2269_v34  ;;  %v2272_v37 = vpop.f32.mrb[18].mxu1  ;;  %v2251_v26 = vpop.f32.mrb[23].mxu0 }
 0x70f   :  { %v2273_v40 = vpop.f32.mrb[19].mxu1 }
 0x710   :  { %v2059_v33 = vadd.f32 %v2271_v32, %v2249_v30 }
 0x72b   :  { %v2291_v42 = vpop.f32.mrb[24].mxu0 }
 0x72c   :  { %v2313_v45 = vpop.f32.mrb[20].mxu1  ;;  %v2292_v57 = vpop.f32.mrb[25].mxu0 }
 0x72d   :  { %v2314_v44 = vpop.f32.mrb[21].mxu1  ;;  %v2293_v31 = vadd.f32 %v2292_v57, %v2291_v42  ;;  %v2294_v9 = vpop.f32.mrb[26].mxu0 }
 0x72e   :  { %v2315_v27 = vadd.f32 %v2314_v44, %v2313_v45  ;;  %v2316_v1 = vpop.f32.mrb[22].mxu1  ;;  %v2295_v39 = vpop.f32.mrb[27].mxu0 }
 0x72f   :  { %v2317_v23 = vpop.f32.mrb[23].mxu1  ;;  %v2099_v43 = vadd.f32 %v2293_v31, %v2059_v33 }
 0x731   :  { %v2139_v47 = vadd.f32 %v2315_v27, %v2099_v43 }
 0x733   :  { %v2151_v49 = vmul.f32 %v2221_v46, %v2139_v47 }
 0x735   :  { %v2159_v12 = vadd.f32 %v2222_v48, %v2151_v49 }
 0x737   :  { %2419 = vtanh.f32 %v2159_v12 }
 0x741   :  { %v2420_v10 = vpop.eup %2419 }
 0x742   :  { %2161 = vst [vmem:[#allocation12] sm:$0xf] %v2420_v10 }
 0x743   :  { %2564 = shalt.err (!%p2561_p10)
}
 0x744   :  { %s2565_s20 = scalar_lea.hbm %s2966_s9, 64 }
 0x745   :  { %p2566_p11 = scmp.ne.s32.totalorder %s2966_s9, %s2565_s20  ;;  %p2569_p12 = scmp.lt.u32.totalorder %s2565_s20, %s2966_s9 }
 0x747   :  { %p2571_p13 = pnand %p2569_p12, %p2566_p11 }
 0x749   :  { %2574 = shalt.err (!%p2571_p13)
}
 0x74a   :  { %2171 = dma.vmem_to_hbm [thread:$0]  %s2169_s16, 64, %s2966_s9, [#allocation8]  }
 0x74b   :  { %2585 = dma.done.wait [#allocation8], 64  }
 0x74c   :  { %2586 = vsyncadd [#allocation8], 4294967232 }
 0x74d   :  { %2175 = vsyncpa [#allocation7], 1 }
 0x74e   :  { %2176 = vsyncpa [#allocation10], 1 }
 0x74f   :  { %2177 = vsyncpa [#allocation8], 1 }
 0x750   :  { %2178 = vsyncmov [#allocation5] }
 0x753   :  { %s2179_s27 = vpop.sfrf %2178 }
 0x754   :  { %p2223_p0 = scmp.ne.s32.totalorder %s2179_s27, 0 }
 0x756   :  { %2183 = shalt.err (%p2223_p0)  }
 0x757   :  { %2185 = vsyncmov [#allocation5 + $0x1] }
 0x75a   :  { %s2186_s28 = vpop.sfrf %2185 }
 0x75b   :  { %p2224_p1 = scmp.ne.s32.totalorder %s2186_s28, 0 }
 0x75d   :  { %2190 = shalt.err (%p2224_p1)  }
 0x75e   :  { %2192 = vsyncmov [#allocation5 + $0x2] }
 0x761   :  { %s2193_s29 = vpop.sfrf %2192 }
 0x762   :  { %p2225_p2 = scmp.ne.s32.totalorder %s2193_s29, 0 }
 0x764   :  { %2197 = shalt.err (%p2225_p2)  }

</bundles_post_ra>
